<compile_context>
chip_gen: v5e
topology: v5e:2x2
jax: 0.10.0
libtpu: 0.0.40
codegen_flags: <defaults>
</compile_context>

<pallas_src>
import jax
import jax.numpy as jnp
from jax.experimental import pallas as pl
from jax.experimental.pallas import tpu as pltpu


def _round_up(x: int, m: int) -> int:
    return (x + m - 1) // m * m


def _tensorcores_per_chip() -> int:
    # v7x has 2 TensorCores per chip; v5e/v6e have 1.  Best-effort detection.
    try:
        kind = jax.devices()[0].device_kind.lower()
    except Exception:
        return 1
    return 2 if ("v7" in kind or "7x" in kind) else 1


def _pick_tile_m(n: int) -> int:
    """Row tile: big tiles for DMA efficiency; >= 2 grid steps only on v7x."""
    n8 = _round_up(max(n, 8), 8)
    if n8 <= 128:
        return n8
    cores = _tensorcores_per_chip()
    # One big tile per TensorCore, a multiple of the 128-row in-kernel
    # sub-block, capped at 512 rows (keeps x/out blocks + resident weights well
    # inside even v7x's 32 MiB scoped-VMEM default at these feature dims).
    t = _round_up(pl.cdiv(n8, cores), 128)
    return min(t, 512)


def _mlp_kernel(x_ref, w1_ref, b1_ref, w2_ref, b2_ref, o_ref):
    # x_ref: (TM, in_dim)        w1_ref: (in_dim, mid_p)   b1_ref: (1, mid_p) f32
    # w2_ref: (mid_p, out_p)     b2_ref: (1, out_p) f32    o_ref: (TM, out_p)
    tile_m = x_ref.shape[0]
    # Bound vreg live ranges: process rows in <=128-row sub-blocks so the
    # (sub_m, mid) f32 intermediate stays a small fraction of the vreg file.
    sub_m = 128 if (tile_m > 128 and tile_m % 128 == 0) else tile_m
    n_sub = tile_m // sub_m

    w1 = w1_ref[...]
    b1 = b1_ref[...]
    w2 = w2_ref[...]
    b2 = b2_ref[...]

    def process(row0):
        x = x_ref[pl.ds(row0, sub_m), :]
        # MXU matmul in native operand dtype, f32 accumulation.
        h = jnp.dot(x, w1, preferred_element_type=jnp.float32) + b1
        h = h * jax.nn.sigmoid(h)  # SiLU (exp on EUP; the divide may hit VALU)
        y = jnp.dot(h.astype(w2.dtype), w2,
                    preferred_element_type=jnp.float32) + b2
        o_ref[pl.ds(row0, sub_m), :] = y.astype(o_ref.dtype)

    if n_sub == 1:
        process(0)
    else:
        def body(i, carry):
            process(pl.multiple_of(i * sub_m, sub_m))
            return carry
        jax.lax.fori_loop(0, n_sub, body, 0, unroll=True)


def mlp_forward(x, w1, b1, w2, b2, *, tile_m=None):
    """x: (N, in_dim); w1: (in_dim, mid); b1: (mid,); w2: (mid, out); b2: (out,)."""
    n, in_dim = x.shape
    mid_dim = w1.shape[1]
    out_dim = w2.shape[1]

    # Lane-dense padding of mid/out only (exact: zero mid cols give silu(0)=0
    # which meets zero W2 rows; padded out cols are sliced off).  in_dim and
    # the row count are passed through unpadded.
    mid_p = _round_up(mid_dim, 128)
    out_p = _round_up(out_dim, 128)

    if tile_m is None:
        tile_m = _pick_tile_m(n)
    grid = (pl.cdiv(n, tile_m),)

    # One-time, tiny parameter pads (weights/biases only; x is untouched).
    w1_p = w1 if mid_p == mid_dim else jnp.pad(w1, ((0, 0), (0, mid_p - mid_dim)))
    w2_p = w2
    if mid_p != mid_dim or out_p != out_dim:
        w2_p = jnp.pad(w2, ((0, mid_p - mid_dim), (0, out_p - out_dim)))
    b1_p = jnp.pad(b1, (0, mid_p - mid_dim)).astype(jnp.float32).reshape(1, mid_p)
    b2_p = jnp.pad(b2, (0, out_p - out_dim)).astype(jnp.float32).reshape(1, out_p)

    # VMEM footprint estimate (double-buffered blocks); only raise the scoped
    # limit when the defaults would be exceeded (matters on v7x: 32 MiB scoped
    # default / 64 MiB physical).
    itemsize = jnp.dtype(x.dtype).itemsize
    w_itemsize = jnp.dtype(w1.dtype).itemsize
    vmem_est = (2 * (tile_m * in_dim + tile_m * out_p) * itemsize
                + 2 * (in_dim * mid_p + mid_p * out_p) * w_itemsize
                + 2 * (mid_p + out_p) * 4)
    cp = {"dimension_semantics": ("parallel",)}
    if vmem_est > 32 * 1024 * 1024:
        cp["vmem_limit_bytes"] = min(int(vmem_est * 5 // 4), 64 * 1024 * 1024)
    # TODO(synk): for much larger in/mid dims, tile the contraction axes with a
    # f32 VMEM accumulator, and single-buffer the constant-index weight blocks
    # (pipeline_mode=pl.Buffered(1)) to halve the resident footprint on v7x.

    out_padded = pl.pallas_call(
        _mlp_kernel,
        out_shape=jax.ShapeDtypeStruct((n, out_p), x.dtype),
        grid_spec=pltpu.PrefetchScalarGridSpec(
            num_scalar_prefetch=0,
            grid=grid,
            in_specs=[
                pl.BlockSpec((tile_m, in_dim), lambda i: (i, 0)),  # x row tile
                pl.BlockSpec((in_dim, mid_p), lambda i: (0, 0)),   # W1 (resident)
                pl.BlockSpec((1, mid_p), lambda i: (0, 0)),        # b1 (f32)
                pl.BlockSpec((mid_p, out_p), lambda i: (0, 0)),    # W2 (resident)
                pl.BlockSpec((1, out_p), lambda i: (0, 0)),        # b2 (f32)
            ],
            out_specs=pl.BlockSpec((tile_m, out_p), lambda i: (i, 0)),
        ),
        compiler_params=pltpu.CompilerParams(**cp),
    )(x, w1_p, b1_p, w2_p, b2_p)

    if out_p == out_dim:
        return out_padded
    return out_padded[:, :out_dim]


def mlp_reference(x, w1, b1, w2, b2):
    xf = x.astype(jnp.float32)
    h = xf @ w1.astype(jnp.float32) + b1.astype(jnp.float32)
    h = h * jax.nn.sigmoid(h)
    y = h @ w2.astype(jnp.float32) + b2.astype(jnp.float32)
    return y.astype(x.dtype)


if __name__ == "__main__":
    # Shapes consistent with MLP(in_dim=32, out_dim=64, mid_dim=128).
    # N = 500 flattened tokens: deliberately NOT a multiple of the row tile to
    # exercise the ragged last block (no wrapper-side row padding).
    in_dim, mid_dim, out_dim = 32, 128, 64
    batch = 500

    key = jax.random.PRNGKey(0)
    kx, kw1, kb1, kw2, kb2 = jax.random.split(key, 5)

    x = jax.random.normal(kx, (batch, in_dim), dtype=jnp.float32)
    # PyTorch Linear stores weight (out, in), bias (out,); kept pre-transposed
    # here as (in, out) for row-major matmul.
    w1 = jax.random.normal(kw1, (in_dim, mid_dim), dtype=jnp.float32) * 0.05
    b1 = jax.random.normal(kb1, (mid_dim,), dtype=jnp.float32) * 0.05
    w2 = jax.random.normal(kw2, (mid_dim, out_dim), dtype=jnp.float32) * 0.05
    b2 = jax.random.normal(kb2, (out_dim,), dtype=jnp.float32) * 0.05

    ref = mlp_reference(x, w1, b1, w2, b2)

    # f32 path (strict check).
    out = jax.block_until_ready(mlp_forward(x, w1, b1, w2, b2))
    assert out.shape == (batch, out_dim)
    assert jnp.allclose(out, ref, atol=1e-4, rtol=1e-4), "f32 mismatch vs reference"

    # bf16 operand path (the main HBM/MXU lever on v6e/v7x): same kernel with
    # native bf16 operands and f32 accumulation; loose tolerance vs f32 ref.
    out_bf = jax.block_until_ready(
        mlp_forward(x.astype(jnp.bfloat16), w1.astype(jnp.bfloat16), b1,
                    w2.astype(jnp.bfloat16), b2))
    assert out_bf.dtype == jnp.bfloat16
    assert jnp.allclose(out_bf.astype(jnp.float32), ref, atol=5e-2, rtol=5e-2), \
        "bf16 mismatch vs reference"

    print("KERNEL_OK")
</pallas_src>

<mosaic_0001>
module attributes {stable_mosaic.version = 11 : i64} {
  func.func @_mlp_kernel(%arg0: i32, %arg1: memref<512x32xf32, #tpu.memory_space<vmem>>, %arg2: memref<32x128xf32, #tpu.memory_space<vmem>>, %arg3: memref<1x128xf32, #tpu.memory_space<vmem>>, %arg4: memref<128x128xf32, #tpu.memory_space<vmem>>, %arg5: memref<1x128xf32, #tpu.memory_space<vmem>>, %arg6: memref<512x128xf32, #tpu.memory_space<vmem>>) attributes {dimension_semantics = [#tpu.dimension_semantics<parallel>], iteration_bounds = array<i64: 1>, scalar_prefetch = 0 : i64, scratch_operands = 0 : i64, tpu.core_type = #tpu.core_type<tc>, window_params = [{transform_indices = @transform_0, window_bounds = array<i64: 512, 32>}, {pipeline_mode = #tpu.pipeline_mode<synchronous>, transform_indices = @transform_1, window_bounds = array<i64: 32, 128>}, {pipeline_mode = #tpu.pipeline_mode<synchronous>, transform_indices = @transform_2, window_bounds = array<i64: 1, 128>}, {pipeline_mode = #tpu.pipeline_mode<synchronous>, transform_indices = @transform_3, window_bounds = array<i64: 128, 128>}, {pipeline_mode = #tpu.pipeline_mode<synchronous>, transform_indices = @transform_4, window_bounds = array<i64: 1, 128>}, {transform_indices = @transform_5, window_bounds = array<i64: 512, 128>}]} {
    %c0 = arith.constant 0 : index
    %c0_0 = arith.constant 0 : index
    %0 = vector.load %arg2[%c0, %c0_0] : memref<32x128xf32, #tpu.memory_space<vmem>>, vector<32x128xf32>
    %c0_1 = arith.constant 0 : index
    %c0_2 = arith.constant 0 : index
    %1 = vector.load %arg3[%c0_1, %c0_2] : memref<1x128xf32, #tpu.memory_space<vmem>>, vector<1x128xf32>
    %c0_3 = arith.constant 0 : index
    %c0_4 = arith.constant 0 : index
    %2 = vector.load %arg4[%c0_3, %c0_4] : memref<128x128xf32, #tpu.memory_space<vmem>>, vector<128x128xf32>
    %c0_5 = arith.constant 0 : index
    %c0_6 = arith.constant 0 : index
    %3 = vector.load %arg5[%c0_5, %c0_6] : memref<1x128xf32, #tpu.memory_space<vmem>>, vector<1x128xf32>
    %c0_i32 = arith.constant 0 : i32
    %c128_i32 = arith.constant 128 : i32
    %4 = arith.muli %c0_i32, %c128_i32 : i32
    %5 = tpu.assume_multiple %4, 128 : i32
    %6 = arith.index_cast %5 : i32 to index
    %c0_7 = arith.constant 0 : index
    %7 = vector.load %arg1[%6, %c0_7] : memref<512x32xf32, #tpu.memory_space<vmem>>, vector<128x32xf32>
    %cst = arith.constant dense<0.000000e+00> : vector<128x128xf32>
    %8 = tpu.matmul %7, %0, %cst {dimension_numbers = #tpu.dot_dimension_numbers<[1], [0], [0], [1], [0, 0, 1, 1], [], []>} : vector<128x32xf32>, vector<32x128xf32>, vector<128x128xf32> -> vector<128x128xf32>
    %9 = vector.broadcast %1 : vector<1x128xf32> to vector<128x128xf32>
    %10 = arith.addf %8, %9 : vector<128x128xf32>
    %11 = arith.negf %10 : vector<128x128xf32>
    %12 = math.exp %11 : vector<128x128xf32>
    %cst_8 = arith.constant 1.000000e+00 : f32
    %13 = vector.broadcast %cst_8 : f32 to vector<128x128xf32>
    %14 = arith.addf %13, %12 : vector<128x128xf32>
    %15 = arith.divf %13, %14 : vector<128x128xf32>
    %16 = arith.mulf %10, %15 : vector<128x128xf32>
    %cst_9 = arith.constant dense<0.000000e+00> : vector<128x128xf32>
    %17 = tpu.matmul %16, %2, %cst_9 {dimension_numbers = #tpu.dot_dimension_numbers<[1], [0], [0], [1], [0, 0, 1, 1], [], []>} : vector<128x128xf32>, vector<128x128xf32>, vector<128x128xf32> -> vector<128x128xf32>
    %18 = vector.broadcast %3 : vector<1x128xf32> to vector<128x128xf32>
    %19 = arith.addf %17, %18 : vector<128x128xf32>
    %20 = arith.index_cast %5 : i32 to index
    %c0_10 = arith.constant 0 : index
    %21 = vector.load %arg6[%20, %c0_10] : memref<512x128xf32, #tpu.memory_space<vmem>>, vector<128x128xf32>
    tpu.vector_store %arg6[%20, %c0_10], %19 {strides = array<i32>} : memref<512x128xf32, #tpu.memory_space<vmem>>, vector<128x128xf32>,
    %c1_i32 = arith.constant 1 : i32
    %c128_i32_11 = arith.constant 128 : i32
    %22 = arith.muli %c1_i32, %c128_i32_11 : i32
    %23 = tpu.assume_multiple %22, 128 : i32
    %24 = arith.index_cast %23 : i32 to index
    %c0_12 = arith.constant 0 : index
    %25 = vector.load %arg1[%24, %c0_12] : memref<512x32xf32, #tpu.memory_space<vmem>>, vector<128x32xf32>
    %cst_13 = arith.constant dense<0.000000e+00> : vector<128x128xf32>
    %26 = tpu.matmul %25, %0, %cst_13 {dimension_numbers = #tpu.dot_dimension_numbers<[1], [0], [0], [1], [0, 0, 1, 1], [], []>} : vector<128x32xf32>, vector<32x128xf32>, vector<128x128xf32> -> vector<128x128xf32>
    %27 = vector.broadcast %1 : vector<1x128xf32> to vector<128x128xf32>
    %28 = arith.addf %26, %27 : vector<128x128xf32>
    %29 = arith.negf %28 : vector<128x128xf32>
    %30 = math.exp %29 : vector<128x128xf32>
    %cst_14 = arith.constant 1.000000e+00 : f32
    %31 = vector.broadcast %cst_14 : f32 to vector<128x128xf32>
    %32 = arith.addf %31, %30 : vector<128x128xf32>
    %33 = arith.divf %31, %32 : vector<128x128xf32>
    %34 = arith.mulf %28, %33 : vector<128x128xf32>
    %cst_15 = arith.constant dense<0.000000e+00> : vector<128x128xf32>
    %35 = tpu.matmul %34, %2, %cst_15 {dimension_numbers = #tpu.dot_dimension_numbers<[1], [0], [0], [1], [0, 0, 1, 1], [], []>} : vector<128x128xf32>, vector<128x128xf32>, vector<128x128xf32> -> vector<128x128xf32>
    %36 = vector.broadcast %3 : vector<1x128xf32> to vector<128x128xf32>
    %37 = arith.addf %35, %36 : vector<128x128xf32>
    %38 = arith.index_cast %23 : i32 to index
    %c0_16 = arith.constant 0 : index
    %39 = vector.load %arg6[%38, %c0_16] : memref<512x128xf32, #tpu.memory_space<vmem>>, vector<128x128xf32>
    tpu.vector_store %arg6[%38, %c0_16], %37 {strides = array<i32>} : memref<512x128xf32, #tpu.memory_space<vmem>>, vector<128x128xf32>,
    %c2_i32 = arith.constant 2 : i32
    %c128_i32_17 = arith.constant 128 : i32
    %40 = arith.muli %c2_i32, %c128_i32_17 : i32
    %41 = tpu.assume_multiple %40, 128 : i32
    %42 = arith.index_cast %41 : i32 to index
    %c0_18 = arith.constant 0 : index
    %43 = vector.load %arg1[%42, %c0_18] : memref<512x32xf32, #tpu.memory_space<vmem>>, vector<128x32xf32>
    %cst_19 = arith.constant dense<0.000000e+00> : vector<128x128xf32>
    %44 = tpu.matmul %43, %0, %cst_19 {dimension_numbers = #tpu.dot_dimension_numbers<[1], [0], [0], [1], [0, 0, 1, 1], [], []>} : vector<128x32xf32>, vector<32x128xf32>, vector<128x128xf32> -> vector<128x128xf32>
    %45 = vector.broadcast %1 : vector<1x128xf32> to vector<128x128xf32>
    %46 = arith.addf %44, %45 : vector<128x128xf32>
    %47 = arith.negf %46 : vector<128x128xf32>
    %48 = math.exp %47 : vector<128x128xf32>
    %cst_20 = arith.constant 1.000000e+00 : f32
    %49 = vector.broadcast %cst_20 : f32 to vector<128x128xf32>
    %50 = arith.addf %49, %48 : vector<128x128xf32>
    %51 = arith.divf %49, %50 : vector<128x128xf32>
    %52 = arith.mulf %46, %51 : vector<128x128xf32>
    %cst_21 = arith.constant dense<0.000000e+00> : vector<128x128xf32>
    %53 = tpu.matmul %52, %2, %cst_21 {dimension_numbers = #tpu.dot_dimension_numbers<[1], [0], [0], [1], [0, 0, 1, 1], [], []>} : vector<128x128xf32>, vector<128x128xf32>, vector<128x128xf32> -> vector<128x128xf32>
    %54 = vector.broadcast %3 : vector<1x128xf32> to vector<128x128xf32>
    %55 = arith.addf %53, %54 : vector<128x128xf32>
    %56 = arith.index_cast %41 : i32 to index
    %c0_22 = arith.constant 0 : index
    %57 = vector.load %arg6[%56, %c0_22] : memref<512x128xf32, #tpu.memory_space<vmem>>, vector<128x128xf32>
    tpu.vector_store %arg6[%56, %c0_22], %55 {strides = array<i32>} : memref<512x128xf32, #tpu.memory_space<vmem>>, vector<128x128xf32>,
    %c3_i32 = arith.constant 3 : i32
    %c128_i32_23 = arith.constant 128 : i32
    %58 = arith.muli %c3_i32, %c128_i32_23 : i32
    %59 = tpu.assume_multiple %58, 128 : i32
    %60 = arith.index_cast %59 : i32 to index
    %c0_24 = arith.constant 0 : index
    %61 = vector.load %arg1[%60, %c0_24] : memref<512x32xf32, #tpu.memory_space<vmem>>, vector<128x32xf32>
    %cst_25 = arith.constant dense<0.000000e+00> : vector<128x128xf32>
    %62 = tpu.matmul %61, %0, %cst_25 {dimension_numbers = #tpu.dot_dimension_numbers<[1], [0], [0], [1], [0, 0, 1, 1], [], []>} : vector<128x32xf32>, vector<32x128xf32>, vector<128x128xf32> -> vector<128x128xf32>
    %63 = vector.broadcast %1 : vector<1x128xf32> to vector<128x128xf32>
    %64 = arith.addf %62, %63 : vector<128x128xf32>
    %65 = arith.negf %64 : vector<128x128xf32>
    %66 = math.exp %65 : vector<128x128xf32>
    %cst_26 = arith.constant 1.000000e+00 : f32
    %67 = vector.broadcast %cst_26 : f32 to vector<128x128xf32>
    %68 = arith.addf %67, %66 : vector<128x128xf32>
    %69 = arith.divf %67, %68 : vector<128x128xf32>
    %70 = arith.mulf %64, %69 : vector<128x128xf32>
    %cst_27 = arith.constant dense<0.000000e+00> : vector<128x128xf32>
    %71 = tpu.matmul %70, %2, %cst_27 {dimension_numbers = #tpu.dot_dimension_numbers<[1], [0], [0], [1], [0, 0, 1, 1], [], []>} : vector<128x128xf32>, vector<128x128xf32>, vector<128x128xf32> -> vector<128x128xf32>
    %72 = vector.broadcast %3 : vector<1x128xf32> to vector<128x128xf32>
    %73 = arith.addf %71, %72 : vector<128x128xf32>
    %74 = arith.index_cast %59 : i32 to index
    %c0_28 = arith.constant 0 : index
    %75 = vector.load %arg6[%74, %c0_28] : memref<512x128xf32, #tpu.memory_space<vmem>>, vector<128x128xf32>
    tpu.vector_store %arg6[%74, %c0_28], %73 {strides = array<i32>} : memref<512x128xf32, #tpu.memory_space<vmem>>, vector<128x128xf32>,
    %c4_i32 = arith.constant 4 : i32
    return
  }
  func.func @transform_0(%arg0: i32) -> (i32, i32) {
    %c0_i32 = arith.constant 0 : i32
    %c0_i32_0 = arith.constant 0 : i32
    return %arg0, %c0_i32 : i32, i32
  }
  func.func @transform_1(%arg0: i32) -> (i32, i32) {
    %c0_i32 = arith.constant 0 : i32
    %c0_i32_0 = arith.constant 0 : i32
    %c0_i32_1 = arith.constant 0 : i32
    return %c0_i32, %c0_i32_0 : i32, i32
  }
  func.func @transform_2(%arg0: i32) -> (i32, i32) {
    %c0_i32 = arith.constant 0 : i32
    %c0_i32_0 = arith.constant 0 : i32
    %c0_i32_1 = arith.constant 0 : i32
    return %c0_i32, %c0_i32_0 : i32, i32
  }
  func.func @transform_3(%arg0: i32) -> (i32, i32) {
    %c0_i32 = arith.constant 0 : i32
    %c0_i32_0 = arith.constant 0 : i32
    %c0_i32_1 = arith.constant 0 : i32
    return %c0_i32, %c0_i32_0 : i32, i32
  }
  func.func @transform_4(%arg0: i32) -> (i32, i32) {
    %c0_i32 = arith.constant 0 : i32
    %c0_i32_0 = arith.constant 0 : i32
    %c0_i32_1 = arith.constant 0 : i32
    return %c0_i32, %c0_i32_0 : i32, i32
  }
  func.func @transform_5(%arg0: i32) -> (i32, i32) {
    %c0_i32 = arith.constant 0 : i32
    %c0_i32_0 = arith.constant 0 : i32
    return %arg0, %c0_i32 : i32, i32
  }
}

</mosaic_0001>

<bundles_post_ra>
// kernel: tpu_custom_call.1
= control target key start
LH: loop header
LB: loop body
LE: loop exit
PB: predicated region body
PF: predicated region fallthrough
CT: control target
= control target key end

     0   :  { %10 = vsyncpa [#allocation3], 0  ;;  %vm62_vm0 = vcmask 261120   ;;  %s4326_s0 = inlined_call_operand.vmem [shape: f32[500,32], index: 0, kind: input, shape index: {}]   ;;  %s4327_s1 = inlined_call_operand.vmem [shape: f32[32,128], index: 1, kind: input, shape index: {}]   ;;  %s4328_s2 = inlined_call_operand.vmem [shape: f32[1,128], index: 2, kind: input, shape index: {}]   ;;  %s4329_s3 = inlined_call_operand.vmem [shape: f32[128,128], index: 3, kind: input, shape index: {}]   ;;  %s4330_s4 = inlined_call_operand.vmem [shape: f32[1,128], index: 4, kind: input, shape index: {}]   ;;  %s4331_s5 = inlined_call_operand.hbm [shape: f32[500,128], index: 5, kind: output, shape index: {}]  }
   0x1   :  { %v2730_v0 = vld [vmem:[%s4327_s1 + $0x18] sm:$0xff]  ;;  %v2735_v1 = vld [vmem:[%s4327_s1 + $0x10] sm:$0xff]  ;;  %v2742_v2 = vld [vmem:[%s4327_s1 + $0x8] sm:$0xff] }
   0x2   :  { %123 = vmatpush.msra.mxu0 %v2730_v0  ;;  %657 = vmatpush.msra.mxu2 %v2730_v0  ;;  %v2749_v3 = vld [vmem:[%s4327_s1] sm:$0xff]  ;;  %v44_v5 = vld [vmem:[%s4326_s0 + $0x8] sm:$0xff]  ;;  %v45_v6 = vld [vmem:[%s4326_s0 + $0x10] sm:$0xff] }
   0x3   :  { %v43_v4 = vld [vmem:[%s4326_s0] sm:$0xff]  ;;  %v46_v7 = vld [vmem:[%s4326_s0 + $0x18] sm:$0xff]  ;;  %v48_v9 = vld [vmem:[%s4326_s0 + $0x28] sm:$0xff] }
   0x4   :  { %124 = vmatpush.msra.mxu0 %v2735_v1  ;;  %658 = vmatpush.msra.mxu2 %v2735_v1  ;;  %v47_v8 = vld [vmem:[%s4326_s0 + $0x20] sm:$0xff]  ;;  %v49_v10 = vld [vmem:[%s4326_s0 + $0x30] sm:$0xff]  ;;  %v50_v11 = vld [vmem:[%s4326_s0 + $0x38] sm:$0xff] }
   0x5   :  { %v51_v12 = vld [vmem:[%s4326_s0 + $0x40] sm:$0xff]  ;;  %v52_v13 = vld [vmem:[%s4326_s0 + $0x48] sm:$0xff]  ;;  %v53_v14 = vld [vmem:[%s4326_s0 + $0x50] sm:$0xff] }
   0x6   :  { %125 = vmatpush.msra.mxu0 %v2742_v2  ;;  %659 = vmatpush.msra.mxu2 %v2742_v2  ;;  %v54_v15 = vld [vmem:[%s4326_s0 + $0x58] sm:$0xff]  ;;  %v55_v16 = vld [vmem:[%s4326_s0 + $0x60] sm:$0xff]  ;;  %v2817_v18 = vld [vmem:[%s4329_s3 + $0x70] sm:$0xff] }
   0x7   :  { %v2809_v17 = vld [vmem:[%s4329_s3 + $0x78] sm:$0xff]  ;;  %v2825_v19 = vld [vmem:[%s4329_s3 + $0x68] sm:$0xff]  ;;  %v2226_v20 = vld [vmem:[%s4326_s0 + $0x80] sm:$0xff] }
   0x8   :  { %126 = vmatpush.msra.mxu0 %v2749_v3  ;;  %660 = vmatpush.msra.mxu2 %v2749_v3  ;;  %v2838_v21 = vld [vmem:[%s4329_s3 + $0x60] sm:$0xff]  ;;  %v56_v22 = vld [vmem:[%s4326_s0 + $0x68] sm:$0xff]  ;;  %v2849_v23 = vld [vmem:[%s4329_s3 + $0x58] sm:$0xff] }
   0x9   :  { %2194 = vmatmul.msk.f32.vlgmr.msra.gmra.mxu0 %vm62_vm0, %v43_v4  ;;  %2370 = vmatpush.msra.mxu1 %v2809_v17  ;;  %v2859_v24 = vld [vmem:[%s4329_s3 + $0x50] sm:$0xff]  ;;  %v2867_v25 = vld [vmem:[%s4329_s3 + $0x48] sm:$0xff]  ;;  %v2880_v27 = vld [vmem:[%s4329_s3 + $0x40] sm:$0xff] }
   0xa   :  { %499 = vmatpush.msrb.mxu0 %v2809_v17  ;;  %1030 = vmatpush.msra.mxu3 %v2809_v17  ;;  %v2227_v26 = vld [vmem:[%s4326_s0 + $0x88] sm:$0xff]  ;;  %v57_v28 = vld [vmem:[%s4326_s0 + $0x70] sm:$0xff]  ;;  %v2891_v29 = vld [vmem:[%s4329_s3 + $0x38] sm:$0xff] }
   0xb   :  { %2371 = vmatpush.msra.mxu1 %v2817_v18  ;;  %1562 = vmatpush.msrb.mxu2 %v2809_v17  ;;  %v2901_v30 = vld [vmem:[%s4329_s3 + $0x30] sm:$0xff]  ;;  %v2909_v31 = vld [vmem:[%s4329_s3 + $0x28] sm:$0xff]  ;;  %v2922_v33 = vld [vmem:[%s4329_s3 + $0x20] sm:$0xff] }
   0xc   :  { %500 = vmatpush.msrb.mxu0 %v2817_v18  ;;  %1031 = vmatpush.msra.mxu3 %v2817_v18  ;;  %v2228_v32 = vld [vmem:[%s4326_s0 + $0x90] sm:$0xff]  ;;  %v58_v34 = vld [vmem:[%s4326_s0 + $0x78] sm:$0xff]  ;;  %v2951_v37 = vld [vmem:[%s4328_s2] ss:$0 sm:$0xff] }
   0xd   :  { %2372 = vmatpush.msra.mxu1 %v2825_v19  ;;  %2242 = vmatmul.msk.f32.vlgmr.msra.gmra.mxu2 %vm62_vm0, %v2226_v20  ;;  %v2933_v35 = vld [vmem:[%s4329_s3 + $0x18] sm:$0xff]  ;;  %v2943_v36 = vld [vmem:[%s4329_s3 + $0x10] sm:$0xff]  ;;  %v2956_v38 = vld [vmem:[%s4329_s3 + $0x8] sm:$0xff] }
   0xe   :  { %501 = vmatpush.msrb.mxu0 %v2825_v19  ;;  %1032 = vmatpush.msra.mxu3 %v2825_v19  ;;  %v2229_v39 = vld [vmem:[%s4326_s0 + $0x98] sm:$0xff]  ;;  %v2969_v40 = vld [vmem:[%s4329_s3] sm:$0xff]  ;;  %v2231_v50 = vld [vmem:[%s4326_s0 + $0xa8] sm:$0xff] }
   0xf   :  { %2373 = vmatpush.msra.mxu1 %v2838_v21  ;;  %1563 = vmatpush.msrb.mxu2 %v2817_v18  ;;  %v2230_v44 = vld [vmem:[%s4326_s0 + $0xa0] sm:$0xff]  ;;  %v2232_v59 = vld [vmem:[%s4326_s0 + $0xb0] sm:$0xff] }
  0x10   :  { %502 = vmatpush.msrb.mxu0 %v2838_v21  ;;  %1033 = vmatpush.msra.mxu3 %v2838_v21 }
  0x11   :  { %2195 = vmatmul.msk.f32.gmra.mxu0 %vm62_vm0, %v44_v5  ;;  %2374 = vmatpush.msra.mxu1 %v2849_v23 }
  0x12   :  { %503 = vmatpush.msrb.mxu0 %v2849_v23  ;;  %1034 = vmatpush.msra.mxu3 %v2849_v23 }
  0x13   :  { %2375 = vmatpush.msra.mxu1 %v2859_v24  ;;  %1564 = vmatpush.msrb.mxu2 %v2825_v19 }
  0x14   :  { %504 = vmatpush.msrb.mxu0 %v2859_v24  ;;  %1035 = vmatpush.msra.mxu3 %v2859_v24 }
  0x15   :  { %2376 = vmatpush.msra.mxu1 %v2867_v25  ;;  %2243 = vmatmul.msk.f32.gmra.mxu2 %vm62_vm0, %v2227_v26 }
  0x16   :  { %505 = vmatpush.msrb.mxu0 %v2867_v25  ;;  %1036 = vmatpush.msra.mxu3 %v2867_v25 }
  0x17   :  { %2377 = vmatpush.msra.mxu1 %v2880_v27  ;;  %1565 = vmatpush.msrb.mxu2 %v2838_v21 }
  0x18   :  { %506 = vmatpush.msrb.mxu0 %v2880_v27  ;;  %1037 = vmatpush.msra.mxu3 %v2880_v27 }
  0x19   :  { %2196 = vmatmul.msk.f32.gmra.mxu0 %vm62_vm0, %v45_v6  ;;  %2378 = vmatpush.msra.mxu1 %v2891_v29 }
  0x1a   :  { %507 = vmatpush.msrb.mxu0 %v2891_v29  ;;  %1038 = vmatpush.msra.mxu3 %v2891_v29 }
  0x1b   :  { %2379 = vmatpush.msra.mxu1 %v2901_v30  ;;  %1566 = vmatpush.msrb.mxu2 %v2849_v23 }
  0x1c   :  { %508 = vmatpush.msrb.mxu0 %v2901_v30  ;;  %1039 = vmatpush.msra.mxu3 %v2901_v30 }
  0x1d   :  { %2380 = vmatpush.msra.mxu1 %v2909_v31  ;;  %2244 = vmatmul.msk.f32.gmra.mxu2 %vm62_vm0, %v2228_v32  ;;  %v2234_v32 = vld [vmem:[%s4326_s0 + $0xc0] sm:$0xff] }
  0x1e   :  { %509 = vmatpush.msrb.mxu0 %v2909_v31  ;;  %1040 = vmatpush.msra.mxu3 %v2909_v31 }
  0x1f   :  { %2381 = vmatpush.msra.mxu1 %v2922_v33  ;;  %1567 = vmatpush.msrb.mxu2 %v2859_v24 }
  0x20   :  { %510 = vmatpush.msrb.mxu0 %v2922_v33  ;;  %1041 = vmatpush.msra.mxu3 %v2922_v33 }
  0x21   :  { %2197 = vmatmul.msk.f32.gmra.mxu0 %vm62_vm0, %v46_v7  ;;  %2382 = vmatpush.msra.mxu1 %v2933_v35 }
  0x22   :  { %511 = vmatpush.msrb.mxu0 %v2933_v35  ;;  %1042 = vmatpush.msra.mxu3 %v2933_v35 }
  0x23   :  { %2383 = vmatpush.msra.mxu1 %v2943_v36  ;;  %1568 = vmatpush.msrb.mxu2 %v2867_v25 }
  0x24   :  { %512 = vmatpush.msrb.mxu0 %v2943_v36  ;;  %1043 = vmatpush.msra.mxu3 %v2943_v36 }
  0x25   :  { %2384 = vmatpush.msra.mxu1 %v2956_v38  ;;  %2245 = vmatmul.msk.f32.gmra.mxu2 %vm62_vm0, %v2229_v39 }
  0x26   :  { %513 = vmatpush.msrb.mxu0 %v2956_v38  ;;  %1044 = vmatpush.msra.mxu3 %v2956_v38 }
  0x27   :  { %2385 = vmatpush.msra.mxu1 %v2969_v40  ;;  %1569 = vmatpush.msrb.mxu2 %v2880_v27 }
  0x28   :  { %514 = vmatpush.msrb.mxu0 %v2969_v40  ;;  %1045 = vmatpush.msra.mxu3 %v2969_v40 }
  0x29   :  { %2198 = vmatmul.msk.f32.gmra.mxu0 %vm62_vm0, %v47_v8  ;;  %1721 = vmatpush.msrb.mxu1 %v2730_v0 }
  0x2a   :  { %1189 = vmatpush.msra.mxu0 %v2730_v0  ;;  %1570 = vmatpush.msrb.mxu2 %v2891_v29 }
  0x2b   :  { %1722 = vmatpush.msrb.mxu1 %v2735_v1  ;;  %2386 = vmatpush.msrb.mxu3 %v2809_v17 }
  0x2c   :  { %1190 = vmatpush.msra.mxu0 %v2735_v1  ;;  %1571 = vmatpush.msrb.mxu2 %v2901_v30 }
  0x2d   :  { %1723 = vmatpush.msrb.mxu1 %v2742_v2  ;;  %2387 = vmatpush.msrb.mxu3 %v2817_v18 }
  0x2e   :  { %1191 = vmatpush.msra.mxu0 %v2742_v2  ;;  %2246 = vmatmul.msk.f32.gmra.mxu2 %vm62_vm0, %v2230_v44 }
  0x2f   :  { %1724 = vmatpush.msrb.mxu1 %v2749_v3  ;;  %1572 = vmatpush.msrb.mxu2 %v2909_v31 }
  0x30   :  { %1192 = vmatpush.msra.mxu0 %v2749_v3  ;;  %2388 = vmatpush.msrb.mxu3 %v2825_v19 }
  0x31   :  { %2199 = vmatmul.msk.f32.gmra.mxu0 %vm62_vm0, %v48_v9  ;;  %1573 = vmatpush.msrb.mxu2 %v2922_v33 }
  0x32   :  { %2389 = vmatpush.msrb.mxu3 %v2838_v21 }
  0x33   :  { %1574 = vmatpush.msrb.mxu2 %v2933_v35 }
  0x34   :  { %2390 = vmatpush.msrb.mxu3 %v2849_v23 }
  0x35   :  { %1575 = vmatpush.msrb.mxu2 %v2943_v36 }
  0x36   :  { %2247 = vmatmul.msk.f32.gmra.mxu2 %vm62_vm0, %v2231_v50  ;;  %2391 = vmatpush.msrb.mxu3 %v2859_v24  ;;  %v2275_v50 = vld [vmem:[%s4326_s0 + $0x108] sm:$0xff] }
  0x37   :  { %1576 = vmatpush.msrb.mxu2 %v2956_v38 }
  0x38   :  { %2392 = vmatpush.msrb.mxu3 %v2867_v25 }
  0x39   :  { %2200 = vmatmul.msk.f32.gmra.mxu0 %vm62_vm0, %v49_v10  ;;  %1577 = vmatpush.msrb.mxu2 %v2969_v40 }
  0x3a   :  { %2393 = vmatpush.msrb.mxu3 %v2880_v27 }
  0x3b   :  { %2094 = vmatpush.msra.mxu2 %v2809_v17 }
  0x3c   :  { %2394 = vmatpush.msrb.mxu3 %v2891_v29 }
  0x3d   :  { %2095 = vmatpush.msra.mxu2 %v2817_v18 }
  0x3e   :  { %2395 = vmatpush.msrb.mxu3 %v2901_v30  ;;  %2248 = vmatmul.msk.f32.gmra.mxu2 %vm62_vm0, %v2232_v59 }
  0x3f   :  { %2096 = vmatpush.msra.mxu2 %v2825_v19 }
  0x40   :  { %2396 = vmatpush.msrb.mxu3 %v2909_v31 }
  0x41   :  { %2201 = vmatmul.msk.f32.gmra.mxu0 %vm62_vm0, %v50_v11  ;;  %2097 = vmatpush.msra.mxu2 %v2838_v21 }
  0x42   :  { %2397 = vmatpush.msrb.mxu3 %v2922_v33 }
  0x43   :  { %2098 = vmatpush.msra.mxu2 %v2849_v23 }
  0x44   :  { %2398 = vmatpush.msrb.mxu3 %v2933_v35 }
  0x45   :  { %2099 = vmatpush.msra.mxu2 %v2859_v24 }
  0x46   :  { %2399 = vmatpush.msrb.mxu3 %v2943_v36 }
  0x47   :  { %2100 = vmatpush.msra.mxu2 %v2867_v25 }
  0x48   :  { %2400 = vmatpush.msrb.mxu3 %v2956_v38 }
  0x49   :  { %2202 = vmatmul.msk.f32.gmra.mxu0 %vm62_vm0, %v51_v12  ;;  %v2233_v12 = vld [vmem:[%s4326_s0 + $0xb8] sm:$0xff]  ;;  %2101 = vmatpush.msra.mxu2 %v2880_v27  ;;  %v2274_v27 = vld [vmem:[%s4326_s0 + $0x100] sm:$0xff] }
  0x4a   :  { %2249 = vmatmul.msk.f32.gmra.mxu2 %vm62_vm0, %v2233_v12  ;;  %2401 = vmatpush.msrb.mxu3 %v2969_v40 }
  0x4b   :  { %2102 = vmatpush.msra.mxu2 %v2891_v29 }
  0x4d   :  { %2103 = vmatpush.msra.mxu2 %v2901_v30 }
  0x4f   :  { %2104 = vmatpush.msra.mxu2 %v2909_v31 }
  0x51   :  { %2203 = vmatmul.msk.f32.gmra.mxu0 %vm62_vm0, %v52_v13  ;;  %2105 = vmatpush.msra.mxu2 %v2922_v33 }
  0x52   :  { %2250 = vmatmul.msk.f32.gmra.mxu2 %vm62_vm0, %v2234_v32 }
  0x53   :  { %2106 = vmatpush.msra.mxu2 %v2933_v35  ;;  %v2235_v35 = vld [vmem:[%s4326_s0 + $0xc8] sm:$0xff] }
  0x55   :  { %2107 = vmatpush.msra.mxu2 %v2943_v36 }
  0x57   :  { %2108 = vmatpush.msra.mxu2 %v2956_v38  ;;  %v2276_v38 = vld [vmem:[%s4326_s0 + $0x110] sm:$0xff] }
  0x59   :  { %2204 = vmatmul.msk.f32.gmra.mxu0 %vm62_vm0, %v53_v14  ;;  %2109 = vmatpush.msra.mxu2 %v2969_v40 }
  0x5a   :  { %2251 = vmatmul.msk.f32.gmra.mxu2 %vm62_vm0, %v2235_v35 }
  0x61   :  { %2205 = vmatmul.msk.f32.gmra.mxu0 %vm62_vm0, %v54_v15 }
  0x69   :  { %2206 = vmatmul.msk.f32.gmra.mxu0 %vm62_vm0, %v55_v16 }
  0x71   :  { %2207 = vmatmul.msk.f32.gmra.mxu0 %vm62_vm0, %v56_v22 }
  0x79   :  { %2208 = vmatmul.msk.f32.gmra.mxu0 %vm62_vm0, %v57_v28 }
  0x81   :  { %2209 = vmatmul.msk.f32.gmra.mxu0 %vm62_vm0, %v58_v34 }
  0x86   :  { %v128_v41 = vpop.f32.mrf.mxu0 }
  0x87   :  { %v2975_v42 = vadd.f32 %v2951_v37, %v128_v41 }
  0x89   :  { %v2210_v43 = vmul.f32 -1.442695, %v2975_v42 }
  0x8b   :  { %2407 = vpow2.f32 %v2210_v43 }
  0x8e   :  { %v131_v45 = vpop.f32.mrf.mxu0 }
  0x8f   :  { %v2998_v46 = vadd.f32 %v2951_v37, %v131_v45 }
  0x91   :  { %v2408_v47 = vpop.eup %2407  ;;  %v2211_v48 = vmul.f32 -1.442695, %v2998_v46 }
  0x92   :  { %v224_v49 = vadd.f32 1.0, %v2408_v47 }
  0x93   :  { %2409 = vpow2.f32 %v2211_v48 }
  0x94   :  { %2411 = vrcp.f32 %v224_v49  ;;  %v251_v60 = vand.u32 2147483648, %v224_v49  ;;  %v249_v63 = vand.u32 2147483647, %v224_v49  ;;  %vm245_vm2 = vweird.f32 %v224_v49 }
  0x96   :  { %v134_v51 = vpop.f32.mrf.mxu0  ;;  %v252_v5 = vor.u32 1.1754944e-38, %v251_v60  ;;  %vm250_vm4 = vcmp.eq.f32.partialorder %v249_v63, 8.507059e+37 }
  0x97   :  { %v3014_v52 = vadd.f32 %v2951_v37, %v134_v51 }
  0x99   :  { %v2410_v53 = vpop.eup %2409  ;;  %v2212_v54 = vmul.f32 -1.442695, %v3014_v52 }
  0x9a   :  { %v2412_v55 = vpop.eup %2411  ;;  %v3021_v56 = vadd.f32 1.0, %v2410_v53 }
  0x9b   :  { %v241_v57 = vmul.f32 %v2412_v55, %v224_v49  ;;  %2413 = vpow2.f32 %v2212_v54  ;;  %vm246_vm1 = vweird.f32 %v2412_v55 }
  0x9c   :  { %2415 = vrcp.f32 %v3021_v56  ;;  %vm247_vm3 = vmor %vm245_vm2, %vm246_vm1  ;;  %v266_v14 = vand.u32 2147483648, %v3021_v56  ;;  %v264_v17 = vand.u32 2147483647, %v3021_v56  ;;  %vm260_vm6 = vweird.f32 %v3021_v56 }
  0x9d   :  { %v242_v58 = vsub.f32 1.0, %v241_v57 }
  0x9e   :  { %v137_v61 = vpop.f32.mrf.mxu0  ;;  %v267_v23 = vor.u32 1.1754944e-38, %v266_v14  ;;  %vm265_vm8 = vcmp.eq.f32.partialorder %v264_v17, 8.507059e+37 }
  0x9f   :  { %v243_v62 = vmul.f32 %v2412_v55, %v242_v58  ;;  %v3033_v0 = vadd.f32 %v2951_v37, %v137_v61 }
  0xa1   :  { %v2414_v1 = vpop.eup %2413  ;;  %v244_v2 = vadd.f32 %v2412_v55, %v243_v62  ;;  %v2213_v3 = vmul.f32 -1.442695, %v3033_v0 }
  0xa2   :  { %v2416_v4 = vpop.eup %2415  ;;  %v3040_v6 = vadd.f32 1.0, %v2414_v1 }
  0xa3   :  { %v248_v7 = vsel %vm247_vm3, %v2412_v55, %v244_v2  ;;  %2417 = vpow2.f32 %v2213_v3  ;;  %v256_v8 = vmul.f32 %v2416_v4, %v3021_v56  ;;  %vm261_vm5 = vweird.f32 %v2416_v4 }
  0xa4   :  { %v253_v9 = vsel %vm250_vm4, %v252_v5, %v248_v7  ;;  %2419 = vrcp.f32 %v3040_v6  ;;  %vm262_vm7 = vmor %vm260_vm6, %vm261_vm5  ;;  %v281_v39 = vand.u32 2147483648, %v3040_v6  ;;  %vm275_vm10 = vweird.f32 %v3040_v6  ;;  %v2236_v5 = vld [vmem:[%s4326_s0 + $0xd0] sm:$0xff] }
  0xa5   :  { %v480_v10 = vmul.f32 %v253_v9, %v2975_v42  ;;  %v257_v11 = vsub.f32 1.0, %v256_v8  ;;  %v279_v42 = vand.u32 2147483647, %v3040_v6  ;;  %2252 = vmatmul.msk.f32.gmra.mxu2 %vm62_vm0, %v2236_v5 }
  0xa6   :  { %v140_v13 = vpop.f32.mrf.mxu0  ;;  %v282_v47 = vor.u32 1.1754944e-38, %v281_v39 }
  0xa7   :  { %v3055_v15 = vadd.f32 %v2951_v37, %v140_v13  ;;  %515 = vmatmul.f32.vlgmr.msrb.gmra.mxu0 %v480_v10  ;;  %v258_v16 = vmul.f32 %v2416_v4, %v257_v11  ;;  %vm280_vm12 = vcmp.eq.f32.partialorder %v279_v42, 8.507059e+37 }
  0xa9   :  { %v2418_v18 = vpop.eup %2417  ;;  %v2214_v19 = vmul.f32 -1.442695, %v3055_v15  ;;  %v259_v20 = vadd.f32 %v2416_v4, %v258_v16 }
  0xaa   :  { %v2420_v21 = vpop.eup %2419  ;;  %v3063_v22 = vadd.f32 1.0, %v2418_v18 }
  0xab   :  { %2421 = vpow2.f32 %v2214_v19  ;;  %v263_v24 = vsel %vm262_vm7, %v2416_v4, %v259_v20  ;;  %v271_v25 = vmul.f32 %v2420_v21, %v3040_v6  ;;  %vm276_vm9 = vweird.f32 %v2420_v21  ;;  %v2277_v19 = vld [vmem:[%s4326_s0 + $0x118] sm:$0xff] }
  0xac   :  { %2423 = vrcp.f32 %v3063_v22  ;;  %v268_v26 = vsel %vm265_vm8, %v267_v23, %v263_v24  ;;  %vm277_vm11 = vmor %vm275_vm10, %vm276_vm9  ;;  %v296_v55 = vand.u32 2147483648, %v3063_v22  ;;  %v294_v36 = vand.u32 2147483647, %v3063_v22 }
  0xad   :  { %v481_v28 = vmul.f32 %v268_v26, %v2998_v46  ;;  %v272_v29 = vsub.f32 1.0, %v271_v25  ;;  %vm290_vm14 = vweird.f32 %v3063_v22 }
  0xae   :  { %v143_v34 = vpop.f32.mrf.mxu0  ;;  %v297_v62 = vor.u32 1.1754944e-38, %v296_v55  ;;  %vm295_vm1 = vcmp.eq.f32.partialorder %v294_v36, 8.507059e+37 }
  0xaf   :  { %v3080_v30 = vadd.f32 %v2951_v37, %v143_v34  ;;  %518 = vmatmul.f32.vlgmr.msra.gmra.mxu1 %v481_v28  ;;  %2290 = vmatmul.msk.f32.vlgmr.msra.gmra.mxu0 %vm62_vm0, %v2274_v27  ;;  %v273_v41 = vmul.f32 %v2420_v21, %v272_v29 }
  0xb1   :  { %v2422_v43 = vpop.eup %2421  ;;  %v2215_v31 = vmul.f32 -1.442695, %v3080_v30  ;;  %v274_v44 = vadd.f32 %v2420_v21, %v273_v41 }
  0xb2   :  { %v2424_v45 = vpop.eup %2423  ;;  %v3087_v46 = vadd.f32 1.0, %v2422_v43 }
  0xb3   :  { %2425 = vpow2.f32 %v2215_v31  ;;  %v278_v48 = vsel %vm277_vm11, %v2420_v21, %v274_v44  ;;  %v286_v49 = vmul.f32 %v2424_v45, %v3063_v22  ;;  %vm291_vm13 = vweird.f32 %v2424_v45  ;;  %v2237_v22 = vld [vmem:[%s4326_s0 + $0xd8] sm:$0xff]  ;;  %v2278_v31 = vld [vmem:[%s4326_s0 + $0x120] sm:$0xff] }
  0xb4   :  { %2427 = vrcp.f32 %v3087_v46  ;;  %v283_v33 = vsel %vm280_vm12, %v282_v47, %v278_v48  ;;  %vm292_vm15 = vmor %vm290_vm14, %vm291_vm13  ;;  %v311_v40 = vand.u32 2147483648, %v3087_v46  ;;  %vm305_vm3 = vweird.f32 %v3087_v46  ;;  %2253 = vmatmul.msk.f32.gmra.mxu2 %vm62_vm0, %v2237_v22 }
  0xb5   :  { %v482_v51 = vmul.f32 %v283_v33, %v3014_v52  ;;  %v287_v53 = vsub.f32 1.0, %v286_v49 }
  0xb6   :  { %v146_v54 = vpop.f32.mrf.mxu0  ;;  %v312_v14 = vor.u32 1.1754944e-38, %v311_v40 }
  0xb7   :  { %v3103_v56 = vadd.f32 %v2951_v37, %v146_v54  ;;  %521 = vmatmul.f32.gmra.mxu1 %v482_v51  ;;  %2291 = vmatmul.msk.f32.gmra.mxu0 %vm62_vm0, %v2275_v50  ;;  %v288_v57 = vmul.f32 %v2424_v45, %v287_v53 }
  0xb9   :  { %v2426_v52 = vpop.eup %2425  ;;  %v2216_v58 = vmul.f32 -1.442695, %v3103_v56  ;;  %v289_v59 = vadd.f32 %v2424_v45, %v288_v57 }
  0xba   :  { %v2428_v60 = vpop.eup %2427  ;;  %v229_v61 = vadd.f32 1.0, %v2426_v52 }
  0xbb   :  { %2429 = vpow2.f32 %v2216_v58  ;;  %v293_v63 = vsel %vm292_vm15, %v2424_v45, %v289_v59  ;;  %v301_v1 = vmul.f32 %v2428_v60, %v3087_v46  ;;  %vm306_vm2 = vweird.f32 %v2428_v60  ;;  %v2279_v58 = vld [vmem:[%s4326_s0 + $0x128] sm:$0xff] }
  0xbc   :  { %2431 = vrcp.f32 %v229_v61  ;;  %v298_v2 = vsel %vm295_vm1, %v297_v62, %v293_v63  ;;  %vm307_vm4 = vmor %vm305_vm3, %vm306_vm2  ;;  %v326_v24 = vand.u32 2147483648, %v229_v61  ;;  %v324_v27 = vand.u32 2147483647, %v229_v61 }
  0xbd   :  { %v483_v3 = vmul.f32 %v298_v2, %v3033_v0  ;;  %v302_v4 = vsub.f32 1.0, %v301_v1  ;;  %v309_v0 = vand.u32 2147483647, %v3087_v46  ;;  %vm320_vm7 = vweird.f32 %v229_v61  ;;  %v2238_v46 = vld [vmem:[%s4326_s0 + $0xe0] sm:$0xff] }
  0xbe   :  { %v149_v6 = vpop.f32.mrf.mxu0  ;;  %v327_v39 = vor.u32 1.1754944e-38, %v326_v24  ;;  %vm325_vm9 = vcmp.eq.f32.partialorder %v324_v27, 8.507059e+37  ;;  %2254 = vmatmul.msk.f32.gmra.mxu2 %vm62_vm0, %v2238_v46 }
  0xbf   :  { %v3122_v7 = vadd.f32 %v2951_v37, %v149_v6  ;;  %524 = vmatmul.f32.gmra.mxu1 %v483_v3  ;;  %2292 = vmatmul.msk.f32.gmra.mxu0 %vm62_vm0, %v2276_v38  ;;  %v303_v8 = vmul.f32 %v2428_v60, %v302_v4  ;;  %vm310_vm5 = vcmp.eq.f32.partialorder %v309_v0, 8.507059e+37 }
  0xc1   :  { %v2430_v9 = vpop.eup %2429  ;;  %v2217_v10 = vmul.f32 -1.442695, %v3122_v7  ;;  %v304_v11 = vadd.f32 %v2428_v60, %v303_v8 }
  0xc2   :  { %v2432_v12 = vpop.eup %2431  ;;  %v230_v13 = vadd.f32 1.0, %v2430_v9 }
  0xc3   :  { %2433 = vpow2.f32 %v2217_v10  ;;  %v308_v16 = vsel %vm307_vm4, %v2428_v60, %v304_v11  ;;  %v316_v17 = vmul.f32 %v2432_v12, %v229_v61  ;;  %vm321_vm6 = vweird.f32 %v2432_v12  ;;  %v2239_v61 = vld [vmem:[%s4326_s0 + $0xe8] sm:$0xff]  ;;  %v2280_v10 = vld [vmem:[%s4326_s0 + $0x130] sm:$0xff] }
  0xc4   :  { %2435 = vrcp.f32 %v230_v13  ;;  %v313_v18 = vsel %vm310_vm5, %v312_v14, %v308_v16  ;;  %vm322_vm8 = vmor %vm320_vm7, %vm321_vm6  ;;  %v341_v48 = vand.u32 2147483648, %v230_v13  ;;  %v339_v50 = vand.u32 2147483647, %v230_v13 }
  0xc5   :  { %v484_v20 = vmul.f32 %v313_v18, %v3055_v15  ;;  %v317_v21 = vsub.f32 1.0, %v316_v17  ;;  %vm335_vm11 = vweird.f32 %v230_v13 }
  0xc6   :  { %v152_v23 = vpop.f32.mrf.mxu0  ;;  %v342_v55 = vor.u32 1.1754944e-38, %v341_v48  ;;  %vm340_vm13 = vcmp.eq.f32.partialorder %v339_v50, 8.507059e+37  ;;  %2255 = vmatmul.msk.f32.gmra.mxu2 %vm62_vm0, %v2239_v61 }
  0xc7   :  { %v3137_v25 = vadd.f32 %v2951_v37, %v152_v23  ;;  %527 = vmatmul.f32.gmra.mxu1 %v484_v20  ;;  %2293 = vmatmul.msk.f32.gmra.mxu0 %vm62_vm0, %v2277_v19  ;;  %v318_v26 = vmul.f32 %v2432_v12, %v317_v21 }
  0xc9   :  { %v2434_v28 = vpop.eup %2433  ;;  %v2218_v15 = vmul.f32 -1.442695, %v3137_v25  ;;  %v319_v29 = vadd.f32 %v2432_v12, %v318_v26 }
  0xca   :  { %v2436_v32 = vpop.eup %2435  ;;  %v231_v34 = vadd.f32 1.0, %v2434_v28 }
  0xcb   :  { %2437 = vpow2.f32 %v2218_v15  ;;  %v323_v41 = vsel %vm322_vm8, %v2432_v12, %v319_v29  ;;  %v331_v42 = vmul.f32 %v2436_v32, %v230_v13  ;;  %vm336_vm10 = vweird.f32 %v2436_v32  ;;  %v2240_v13 = vld [vmem:[%s4326_s0 + $0xf0] sm:$0xff]  ;;  %v2281_v15 = vld [vmem:[%s4326_s0 + $0x138] sm:$0xff] }
  0xcc   :  { %2439 = vrcp.f32 %v231_v34  ;;  %v328_v43 = vsel %vm325_vm9, %v327_v39, %v323_v41  ;;  %vm337_vm12 = vmor %vm335_vm11, %vm336_vm10  ;;  %v356_v63 = vand.u32 2147483648, %v231_v34  ;;  %v354_v38 = vand.u32 2147483647, %v231_v34 }
  0xcd   :  { %v485_v44 = vmul.f32 %v328_v43, %v3080_v30  ;;  %v332_v45 = vsub.f32 1.0, %v331_v42  ;;  %vm350_vm15 = vweird.f32 %v231_v34 }
  0xce   :  { %v155_v47 = vpop.f32.mrf.mxu0  ;;  %v357_v40 = vor.u32 1.1754944e-38, %v356_v63  ;;  %vm355_vm2 = vcmp.eq.f32.partialorder %v354_v38, 8.507059e+37  ;;  %2256 = vmatmul.msk.f32.gmra.mxu2 %vm62_vm0, %v2240_v13 }
  0xcf   :  { %v3150_v49 = vadd.f32 %v2951_v37, %v155_v47  ;;  %530 = vmatmul.f32.gmra.mxu1 %v485_v44  ;;  %2294 = vmatmul.msk.f32.gmra.mxu0 %vm62_vm0, %v2278_v31  ;;  %v333_v33 = vmul.f32 %v2436_v32, %v332_v45 }
  0xd1   :  { %v2438_v51 = vpop.eup %2437  ;;  %v2219_v30 = vmul.f32 -1.442695, %v3150_v49  ;;  %v334_v53 = vadd.f32 %v2436_v32, %v333_v33 }
  0xd2   :  { %v2440_v35 = vpop.eup %2439  ;;  %v232_v54 = vadd.f32 1.0, %v2438_v51 }
  0xd3   :  { %2441 = vpow2.f32 %v2219_v30  ;;  %v338_v57 = vsel %vm337_vm12, %v2436_v32, %v334_v53  ;;  %v346_v36 = vmul.f32 %v2440_v35, %v231_v34  ;;  %vm351_vm14 = vweird.f32 %v2440_v35  ;;  %v2241_v34 = vld [vmem:[%s4326_s0 + $0xf8] sm:$0xff]  ;;  %v2282_v30 = vld [vmem:[%s4326_s0 + $0x140] sm:$0xff] }
  0xd4   :  { %2443 = vrcp.f32 %v232_v54  ;;  %v343_v52 = vsel %vm340_vm13, %v342_v55, %v338_v57  ;;  %vm352_vm1 = vmor %vm350_vm15, %vm351_vm14  ;;  %v371_v16 = vand.u32 2147483648, %v232_v54  ;;  %v369_v19 = vand.u32 2147483647, %v232_v54 }
  0xd5   :  { %v486_v59 = vmul.f32 %v343_v52, %v3103_v56  ;;  %v347_v60 = vsub.f32 1.0, %v346_v36  ;;  %vm365_vm4 = vweird.f32 %v232_v54 }
  0xd6   :  { %v158_v62 = vpop.f32.mrf.mxu0  ;;  %v372_v24 = vor.u32 1.1754944e-38, %v371_v16  ;;  %vm370_vm6 = vcmp.eq.f32.partialorder %v369_v19, 8.507059e+37  ;;  %2257 = vmatmul.msk.f32.gmra.mxu2 %vm62_vm0, %v2241_v34 }
  0xd7   :  { %v3163_v1 = vadd.f32 %v2951_v37, %v158_v62  ;;  %533 = vmatmul.f32.gmra.mxu1 %v486_v59  ;;  %2295 = vmatmul.msk.f32.gmra.mxu0 %vm62_vm0, %v2279_v58  ;;  %v348_v2 = vmul.f32 %v2440_v35, %v347_v60  ;;  %v662_v58 = vpop.f32.mrf.mxu2 }
  0xd9   :  { %v2442_v3 = vpop.eup %2441  ;;  %v2220_v56 = vmul.f32 -1.442695, %v3163_v1  ;;  %v349_v4 = vadd.f32 %v2440_v35, %v348_v2 }
  0xda   :  { %v2444_v5 = vpop.eup %2443  ;;  %v233_v6 = vadd.f32 1.0, %v2442_v3 }
  0xdb   :  { %2445 = vpow2.f32 %v2220_v56  ;;  %v353_v8 = vsel %vm352_vm1, %v2440_v35, %v349_v4  ;;  %v361_v0 = vmul.f32 %v2444_v5, %v232_v54  ;;  %vm366_vm3 = vweird.f32 %v2444_v5  ;;  %v2283_v4 = vld [vmem:[%s4326_s0 + $0x148] sm:$0xff] }
  0xdc   :  { %2447 = vrcp.f32 %v233_v6  ;;  %v358_v9 = vsel %vm355_vm2, %v357_v40, %v353_v8  ;;  %vm367_vm5 = vmor %vm365_vm4, %vm366_vm3  ;;  %v386_v41 = vand.u32 2147483648, %v233_v6  ;;  %v384_v31 = vand.u32 2147483647, %v233_v6 }
  0xdd   :  { %v487_v11 = vmul.f32 %v358_v9, %v3122_v7  ;;  %v362_v12 = vsub.f32 1.0, %v361_v0  ;;  %vm380_vm8 = vweird.f32 %v233_v6 }
  0xde   :  { %v161_v14 = vpop.f32.mrf.mxu0  ;;  %v387_v48 = vor.u32 1.1754944e-38, %v386_v41  ;;  %vm385_vm10 = vcmp.eq.f32.partialorder %v384_v31, 8.507059e+37 }
  0xdf   :  { %v3176_v17 = vadd.f32 %v2951_v37, %v161_v14  ;;  %536 = vmatmul.f32.gmra.mxu1 %v487_v11  ;;  %2296 = vmatmul.msk.f32.gmra.mxu0 %vm62_vm0, %v2280_v10  ;;  %v363_v18 = vmul.f32 %v2444_v5, %v362_v12  ;;  %v665_v12 = vpop.f32.mrf.mxu2 }
  0xe0   :  { %v3219_v16 = vadd.f32 %v2951_v37, %v665_v12 }
  0xe1   :  { %v2446_v20 = vpop.eup %2445  ;;  %v2221_v7 = vmul.f32 -1.442695, %v3176_v17  ;;  %v364_v21 = vadd.f32 %v2444_v5, %v363_v18 }
  0xe2   :  { %v2448_v22 = vpop.eup %2447  ;;  %v234_v23 = vadd.f32 1.0, %v2446_v20 }
  0xe3   :  { %2449 = vpow2.f32 %v2221_v7  ;;  %v368_v26 = vsel %vm367_vm5, %v2444_v5, %v364_v21  ;;  %v376_v27 = vmul.f32 %v2448_v22, %v233_v6  ;;  %vm381_vm7 = vweird.f32 %v2448_v22 }
  0xe4   :  { %2451 = vrcp.f32 %v234_v23  ;;  %v373_v28 = vsel %vm370_vm6, %v372_v24, %v368_v26  ;;  %vm382_vm9 = vmor %vm380_vm8, %vm381_vm7  ;;  %v401_v55 = vand.u32 2147483648, %v234_v23  ;;  %v399_v52 = vand.u32 2147483647, %v234_v23 }
  0xe5   :  { %v488_v29 = vmul.f32 %v373_v28, %v3137_v25  ;;  %v377_v32 = vsub.f32 1.0, %v376_v27  ;;  %vm395_vm12 = vweird.f32 %v234_v23  ;;  %v2259_v28 = vmul.f32 -1.442695, %v3219_v16 }
  0xe6   :  { %v164_v39 = vpop.f32.mrf.mxu0  ;;  %v402_v2 = vor.u32 1.1754944e-38, %v401_v55  ;;  %vm400_vm14 = vcmp.eq.f32.partialorder %v399_v52, 8.507059e+37 }
  0xe7   :  { %v3189_v42 = vadd.f32 %v2951_v37, %v164_v39  ;;  %539 = vmatmul.f32.gmra.mxu1 %v488_v29  ;;  %2297 = vmatmul.msk.f32.gmra.mxu0 %vm62_vm0, %v2281_v15  ;;  %v378_v43 = vmul.f32 %v2448_v22, %v377_v32 }
  0xe9   :  { %v2450_v44 = vpop.eup %2449  ;;  %v2222_v25 = vmul.f32 -1.442695, %v3189_v42  ;;  %v379_v45 = vadd.f32 %v2448_v22, %v378_v43 }
  0xea   :  { %v2452_v46 = vpop.eup %2451  ;;  %v235_v47 = vadd.f32 1.0, %v2450_v44 }
  0xeb   :  { %2453 = vpow2.f32 %v2222_v25  ;;  %v383_v33 = vsel %vm382_vm9, %v2448_v22, %v379_v45  ;;  %v391_v50 = vmul.f32 %v2452_v46, %v234_v23  ;;  %vm396_vm11 = vweird.f32 %v2452_v46  ;;  %v2284_v23 = vld [vmem:[%s4326_s0 + $0x150] sm:$0xff] }
  0xec   :  { %2455 = vrcp.f32 %v235_v47  ;;  %v388_v51 = vsel %vm385_vm10, %v387_v48, %v383_v33  ;;  %vm397_vm13 = vmor %vm395_vm12, %vm396_vm11  ;;  %v414_v0 = vand.u32 2147483647, %v235_v47  ;;  %v416_v9 = vand.u32 2147483648, %v235_v47 }
  0xed   :  { %v489_v53 = vmul.f32 %v388_v51, %v3150_v49  ;;  %v392_v35 = vsub.f32 1.0, %v391_v50  ;;  %v3203_v49 = vadd.f32 %v2951_v37, %v662_v58  ;;  %vm410_vm1 = vweird.f32 %v235_v47  ;;  %v2285_v51 = vld [vmem:[%s4326_s0 + $0x158] sm:$0xff] }
  0xee   :  { %v167_v54 = vpop.f32.mrf.mxu0  ;;  %v417_v20 = vor.u32 1.1754944e-38, %v416_v9  ;;  %vm415_vm3 = vcmp.eq.f32.partialorder %v414_v0, 8.507059e+37  ;;  %v2286_v9 = vld [vmem:[%s4326_s0 + $0x160] sm:$0xff] }
  0xef   :  { %v3198_v57 = vadd.f32 %v2951_v37, %v167_v54  ;;  %542 = vmatmul.f32.gmra.mxu1 %v489_v53  ;;  %2298 = vmatmul.msk.f32.gmra.mxu0 %vm62_vm0, %v2282_v30  ;;  %v393_v36 = vmul.f32 %v2452_v46, %v392_v35  ;;  %v2258_v40 = vmul.f32 -1.442695, %v3203_v49 }
  0xf1   :  { %v2454_v59 = vpop.eup %2453  ;;  %v2223_v60 = vmul.f32 -1.442695, %v3198_v57  ;;  %v394_v61 = vadd.f32 %v2452_v46, %v393_v36 }
  0xf2   :  { %v2456_v62 = vpop.eup %2455  ;;  %v3205_v63 = vadd.f32 1.0, %v2454_v59 }
  0xf3   :  { %2457 = vpow2.f32 %v2223_v60  ;;  %v398_v38 = vsel %vm397_vm13, %v2452_v46, %v394_v61  ;;  %v406_v3 = vmul.f32 %v2456_v62, %v235_v47  ;;  %vm411_vm15 = vweird.f32 %v2456_v62 }
  0xf4   :  { %2459 = vrcp.f32 %v3205_v63  ;;  %v403_v56 = vsel %vm400_vm14, %v402_v2, %v398_v38  ;;  %vm412_vm2 = vmor %vm410_vm1, %vm411_vm15  ;;  %v429_v29 = vand.u32 2147483647, %v3205_v63  ;;  %v431_v32 = vand.u32 2147483648, %v3205_v63 }
  0xf5   :  { %v490_v5 = vmul.f32 %v403_v56, %v3163_v1  ;;  %v407_v6 = vsub.f32 1.0, %v406_v3  ;;  %2461 = vpow2.f32 %v2258_v40  ;;  %vm425_vm5 = vweird.f32 %v3205_v63 }
  0xf6   :  { %v170_v8 = vpop.f32.mrf.mxu0  ;;  %v432_v47 = vor.u32 1.1754944e-38, %v431_v32  ;;  %vm430_vm7 = vcmp.eq.f32.partialorder %v429_v29, 8.507059e+37 }
  0xf7   :  { %v3214_v10 = vadd.f32 %v2951_v37, %v170_v8  ;;  %545 = vmatmul.f32.gmra.mxu1 %v490_v5  ;;  %2299 = vmatmul.msk.f32.gmra.mxu0 %vm62_vm0, %v2283_v4  ;;  %v408_v11 = vmul.f32 %v2456_v62, %v407_v6 }
  0xf9   :  { %v2458_v13 = vpop.eup %2457  ;;  %v2224_v14 = vmul.f32 -1.442695, %v3214_v10  ;;  %v409_v1 = vadd.f32 %v2456_v62, %v408_v11 }
  0xfa   :  { %v2460_v18 = vpop.eup %2459  ;;  %v3221_v19 = vadd.f32 1.0, %v2458_v13 }
  0xfb   :  { %2463 = vpow2.f32 %v2224_v14  ;;  %v413_v7 = vsel %vm412_vm2, %v2456_v62, %v409_v1  ;;  %v421_v21 = vmul.f32 %v2460_v18, %v3205_v63  ;;  %v2462_v24 = vpop.eup %2461  ;;  %vm426_vm4 = vweird.f32 %v2460_v18 }
  0xfc   :  { %2465 = vrcp.f32 %v3221_v19  ;;  %v418_v22 = vsel %vm415_vm3, %v417_v20, %v413_v7  ;;  %v3232_v34 = vadd.f32 1.0, %v2462_v24  ;;  %vm427_vm6 = vmor %vm425_vm5, %vm426_vm4  ;;  %v444_v36 = vand.u32 2147483647, %v3221_v19 }
  0xfd   :  { %v491_v26 = vmul.f32 %v418_v22, %v3176_v17  ;;  %v422_v27 = vsub.f32 1.0, %v421_v21  ;;  %2467 = vpow2.f32 %v2259_v28  ;;  %v668_v17 = vpop.f32.mrf.mxu2  ;;  %v446_v52 = vand.u32 2147483648, %v3221_v19 }
  0xfe   :  { %v173_v15 = vpop.f32.mrf.mxu0  ;;  %2469 = vrcp.f32 %v3232_v34  ;;  %v3242_v25 = vadd.f32 %v2951_v37, %v668_v17  ;;  %vm440_vm9 = vweird.f32 %v3221_v19  ;;  %vm445_vm11 = vcmp.eq.f32.partialorder %v444_v36, 8.507059e+37 }
  0xff   :  { %v3235_v39 = vadd.f32 %v2951_v37, %v173_v15  ;;  %548 = vmatmul.f32.gmra.mxu1 %v491_v26  ;;  %2300 = vmatmul.msk.f32.gmra.mxu0 %vm62_vm0, %v2284_v23  ;;  %v423_v41 = vmul.f32 %v2460_v18, %v422_v27  ;;  %v447_v56 = vor.u32 1.1754944e-38, %v446_v52  ;;  %vm779_vm14 = vweird.f32 %v3232_v34 }
 0x100   :  { %v2260_v54 = vmul.f32 -1.442695, %v3242_v25  ;;  %v785_v23 = vand.u32 2147483648, %v3232_v34 }
 0x101   :  { %v2464_v43 = vpop.eup %2463  ;;  %v2225_v31 = vmul.f32 -1.442695, %v3235_v39  ;;  %v424_v44 = vadd.f32 %v2460_v18, %v423_v41 }
 0x102   :  { %v2466_v45 = vpop.eup %2465  ;;  %v3244_v46 = vadd.f32 1.0, %v2464_v43  ;;  %v786_v17 = vor.u32 1.1754944e-38, %v785_v23 }
 0x103   :  { %2471 = vpow2.f32 %v2225_v31  ;;  %v428_v48 = vsel %vm427_vm6, %v2460_v18, %v424_v44  ;;  %v436_v33 = vmul.f32 %v2466_v45, %v3221_v19  ;;  %v2468_v30 = vpop.eup %2467  ;;  %vm441_vm8 = vweird.f32 %v2466_v45 }
 0x104   :  { %2473 = vrcp.f32 %v3244_v46  ;;  %v433_v50 = vsel %vm430_vm7, %v432_v47, %v428_v48  ;;  %v3253_v55 = vpop.eup %2469  ;;  %v3257_v58 = vadd.f32 1.0, %v2468_v30  ;;  %v459_v63 = vand.u32 2147483647, %v3244_v46  ;;  %vm442_vm10 = vmor %vm440_vm9, %vm441_vm8 }
 0x105   :  { %v492_v53 = vmul.f32 %v433_v50, %v3189_v42  ;;  %v437_v35 = vsub.f32 1.0, %v436_v33  ;;  %2475 = vpow2.f32 %v2260_v54  ;;  %v775_v42 = vmul.f32 %v3253_v55, %v3232_v34  ;;  %v671_v60 = vpop.f32.mrf.mxu2 }
 0x106   :  { %2477 = vrcp.f32 %v3257_v58  ;;  %v3266_v2 = vadd.f32 %v2951_v37, %v671_v60  ;;  %v461_v4 = vand.u32 2147483648, %v3244_v46  ;;  %vm455_vm12 = vweird.f32 %v3244_v46 }
 0x107   :  { %551 = vmatmul.f32.gmra.mxu1 %v492_v53  ;;  %2301 = vmatmul.msk.f32.gmra.mxu0 %vm62_vm0, %v2285_v51  ;;  %v438_v59 = vmul.f32 %v2466_v45, %v437_v35  ;;  %v776_v5 = vsub.f32 1.0, %v775_v42  ;;  %vm3279_vm13 = vcmp.eq.f32.partialorder %v459_v63, 8.507059e+37  ;;  %vm780_vm1 = vweird.f32 %v3253_v55 }
 0x108   :  { %v2261_v8 = vmul.f32 -1.442695, %v3266_v2  ;;  %v462_v18 = vor.u32 1.1754944e-38, %v461_v4  ;;  %vm3294_vm2 = vmor %vm779_vm14, %vm780_vm1  ;;  %v800_v47 = vand.u32 2147483648, %v3257_v58  ;;  %vm794_vm6 = vweird.f32 %v3257_v58 }
 0x109   :  { %v2472_v61 = vpop.eup %2471  ;;  %v439_v62 = vadd.f32 %v2466_v45, %v438_v59  ;;  %v777_v20 = vmul.f32 %v3253_v55, %v776_v5 }
 0x10a   :  { %v2474_v38 = vpop.eup %2473  ;;  %v3268_v3 = vadd.f32 1.0, %v2472_v61  ;;  %v3343_v61 = vld [vmem:[%s4328_s2] ss:$0 sm:$0xff] }
 0x10b   :  { %v443_v6 = vsel %vm442_vm10, %v2466_v45, %v439_v62  ;;  %v451_v40 = vmul.f32 %v2474_v38, %v3244_v46  ;;  %v2476_v11 = vpop.eup %2475  ;;  %vm456_vm15 = vweird.f32 %v2474_v38  ;;  %v778_v21 = vadd.f32 %v3253_v55, %v777_v20 }
 0x10c   :  { %2479 = vrcp.f32 %v3268_v3  ;;  %v448_v0 = vsel %vm445_vm11, %v447_v56, %v443_v6  ;;  %v3283_v1 = vpop.eup %2477  ;;  %v3285_v19 = vadd.f32 1.0, %v2476_v11  ;;  %v474_v27 = vand.u32 2147483647, %v3268_v3  ;;  %vm457_vm4 = vmor %vm455_vm12, %vm456_vm15 }
 0x10d   :  { %v493_v12 = vmul.f32 %v448_v0, %v3198_v57  ;;  %v452_v13 = vsub.f32 1.0, %v451_v40  ;;  %2481 = vpow2.f32 %v2261_v8  ;;  %v783_v57 = vand.u32 2147483647, %v3232_v34  ;;  %v674_v15 = vpop.f32.mrf.mxu2  ;;  %v2288_v40 = vld [vmem:[%s4326_s0 + $0x170] sm:$0xff] }
 0x10e   :  { %2483 = vrcp.f32 %v3285_v19  ;;  %v790_v24 = vmul.f32 %v3283_v1, %v3257_v58  ;;  %v476_v28 = vand.u32 2147483648, %v3268_v3  ;;  %v3310_v41 = vadd.f32 %v2951_v37, %v674_v15  ;;  %v2287_v37 = vld [vmem:[%s4326_s0 + $0x168] sm:$0xff] }
 0x10f   :  { %554 = vmatmul.f32.gmra.mxu1 %v493_v12  ;;  %2302 = vmatmul.msk.f32.gmra.mxu0 %vm62_vm0, %v2286_v9  ;;  %v453_v7 = vmul.f32 %v2474_v38, %v452_v13  ;;  %vm3303_vm3 = vcmp.eq.f32.partialorder %v783_v57, 8.507059e+37  ;;  %v782_v34 = vsel %vm3294_vm2, %v3253_v55, %v778_v21  ;;  %vm795_vm7 = vweird.f32 %v3283_v1 }
 0x110   :  { %v791_v43 = vsub.f32 1.0, %v790_v24  ;;  %v2262_v33 = vmul.f32 -1.442695, %v3310_v41  ;;  %v787_v50 = vsel %vm3303_vm3, %v786_v17, %v782_v34  ;;  %v798_v55 = vand.u32 2147483647, %v3257_v58  ;;  %vm796_vm8 = vmor %vm794_vm6, %vm795_vm7 }
 0x111   :  { %v454_v26 = vadd.f32 %v2474_v38, %v453_v7  ;;  %v1014_v53 = vmul.f32 %v787_v50, %v3203_v49  ;;  %v801_v49 = vor.u32 1.1754944e-38, %v800_v47  ;;  %vm470_vm10 = vweird.f32 %v3268_v3 }
 0x112   :  { %v2480_v32 = vpop.eup %2479  ;;  %v792_v35 = vmul.f32 %v3283_v1, %v791_v43  ;;  %vm799_vm9 = vcmp.eq.f32.partialorder %v798_v55, 8.507059e+37  ;;  %v477_v58 = vor.u32 1.1754944e-38, %v476_v28  ;;  %vm475_vm12 = vcmp.eq.f32.partialorder %v474_v27, 8.507059e+37  ;;  %v2289_v27 = vld [vmem:[%s4326_s0 + $0x178] sm:$0xff]  ;;  %v2322_v28 = vld [vmem:[%s4326_s0 + $0x180] sm:$0xff] }
 0x113   :  { %v2482_v31 = vpop.eup %2481  ;;  %v458_v44 = vsel %vm457_vm4, %v2474_v38, %v454_v26  ;;  %v466_v45 = vmul.f32 %v2480_v32, %v3268_v3  ;;  %vm471_vm5 = vweird.f32 %v2480_v32  ;;  %1046 = vmatmul.f32.vlgmr.msra.gmra.mxu3 %v1014_v53  ;;  %v815_v4 = vand.u32 2147483648, %v3285_v19 }
 0x114   :  { %v463_v46 = vsel %vm3279_vm13, %v462_v18, %v458_v44  ;;  %v3322_v48 = vadd.f32 1.0, %v2482_v31  ;;  %v2484_v54 = vpop.eup %2483  ;;  %vm472_vm11 = vmor %vm470_vm10, %vm471_vm5  ;;  %vm809_vm13 = vweird.f32 %v3285_v19  ;;  %v813_v12 = vand.u32 2147483647, %v3285_v19 }
 0x115   :  { %v494_v51 = vmul.f32 %v463_v46, %v3214_v10  ;;  %v467_v30 = vsub.f32 1.0, %v466_v45  ;;  %v793_v10 = vadd.f32 %v3283_v1, %v792_v35  ;;  %v805_v52 = vmul.f32 %v2484_v54, %v3285_v19  ;;  %v677_v42 = vpop.f32.mrf.mxu2  ;;  %v3365_v19 = vld [vmem:[%s4330_s4] ss:$0 sm:$0xff]  ;;  %v2323_v35 = vld [vmem:[%s4326_s0 + $0x188] sm:$0xff] }
 0x116   :  { %2485 = vrcp.f32 %v3322_v48  ;;  %v3346_v62 = vadd.f32 %v3343_v61, %v677_v42  ;;  %vm810_vm14 = vweird.f32 %v2484_v54  ;;  %vm814_vm1 = vcmp.eq.f32.partialorder %v813_v12, 8.507059e+37 }
 0x117   :  { %557 = vmatmul.f32.gmra.mxu1 %v494_v51  ;;  %2303 = vmatmul.msk.f32.gmra.mxu0 %vm62_vm0, %v2287_v37  ;;  %v468_v36 = vmul.f32 %v2480_v32, %v467_v30  ;;  %2487 = vpow2.f32 %v2262_v33  ;;  %v797_v60 = vsel %vm796_vm8, %v3283_v1, %v793_v10  ;;  %v806_v38 = vsub.f32 1.0, %v805_v52  ;;  %vm811_vm15 = vmor %vm809_vm13, %vm810_vm14 }
 0x118   :  { %v802_v63 = vsel %vm799_vm9, %v801_v49, %v797_v60  ;;  %v2263_v8 = vmul.f32 -1.442695, %v3346_v62  ;;  %v830_v23 = vand.u32 2147483648, %v3322_v48  ;;  %vm824_vm2 = vweird.f32 %v3322_v48 }
 0x119   :  { %v469_v59 = vadd.f32 %v2480_v32, %v468_v36  ;;  %v1015_v3 = vmul.f32 %v802_v63, %v3219_v16  ;;  %v807_v0 = vmul.f32 %v2484_v54, %v806_v38  ;;  %v816_v16 = vor.u32 1.1754944e-38, %v815_v4 }
 0x11a   :  { %2489 = vpow2.f32 %v2263_v8  ;;  %v828_v34 = vand.u32 2147483647, %v3322_v48  ;;  %v831_v17 = vor.u32 1.1754944e-38, %v830_v23 }
 0x11b   :  { %v473_v56 = vsel %vm472_vm11, %v2480_v32, %v469_v59  ;;  %v808_v14 = vadd.f32 %v2484_v54, %v807_v0  ;;  %1049 = vmatmul.f32.gmra.mxu3 %v1015_v3 }
 0x11c   :  { %v2486_v5 = vpop.eup %2485  ;;  %v478_v6 = vsel %vm475_vm12, %v477_v58, %v473_v56  ;;  %vm829_vm5 = vcmp.eq.f32.partialorder %v828_v34, 8.507059e+37 }
 0x11d   :  { %v2488_v9 = vpop.eup %2487  ;;  %v495_v11 = vmul.f32 %v478_v6, %v3235_v39  ;;  %v820_v1 = vmul.f32 %v2486_v5, %v3322_v48  ;;  %v812_v18 = vsel %vm811_vm15, %v2484_v54, %v808_v14  ;;  %v680_v20 = vpop.f32.mrf.mxu2  ;;  %vm825_vm3 = vweird.f32 %v2486_v5 }
 0x11e   :  { %v3357_v13 = vadd.f32 1.0, %v2488_v9  ;;  %v817_v7 = vsel %vm814_vm1, %v816_v16, %v812_v18  ;;  %v3368_v57 = vadd.f32 %v3343_v61, %v680_v20  ;;  %vm826_vm4 = vmor %vm824_vm2, %vm825_vm3  ;;  %v2324_v9 = vld [vmem:[%s4326_s0 + $0x190] sm:$0xff] }
 0x11f   :  { %560 = vmatmul.f32.gmra.mxu1 %v495_v11  ;;  %2304 = vmatmul.msk.f32.gmra.mxu0 %vm62_vm0, %v2288_v40  ;;  %v821_v39 = vsub.f32 1.0, %v820_v1  ;;  %v1016_v22 = vmul.f32 %v817_v7, %v3242_v25 }
 0x120   :  { %2491 = vrcp.f32 %v3357_v13  ;;  %v2490_v24 = vpop.eup %2489  ;;  %v2264_v15 = vmul.f32 -1.442695, %v3368_v57  ;;  %v845_v50 = vand.u32 2147483648, %v3357_v13  ;;  %vm839_vm6 = vweird.f32 %v3357_v13 }
 0x121   :  { %v822_v21 = vmul.f32 %v2486_v5, %v821_v39  ;;  %v3381_v32 = vadd.f32 1.0, %v2490_v24  ;;  %v843_v55 = vand.u32 2147483647, %v3357_v13 }
 0x122   :  { %2493 = vpow2.f32 %v2264_v15  ;;  %v846_v59 = vor.u32 1.1754944e-38, %v845_v50 }
 0x123   :  { %v823_v29 = vadd.f32 %v2486_v5, %v822_v21  ;;  %2495 = vrcp.f32 %v3381_v32  ;;  %1052 = vmatmul.f32.gmra.mxu3 %v1016_v22  ;;  %vm844_vm9 = vcmp.eq.f32.partialorder %v843_v55, 8.507059e+37  ;;  %v860_v6 = vand.u32 2147483648, %v3381_v32 }
 0x124   :  { %v516_v26 = vpop.f32.mrf.mxu0  ;;  %vm854_vm10 = vweird.f32 %v3381_v32  ;;  %v858_v18 = vand.u32 2147483647, %v3381_v32 }
 0x125   :  { %v517_v25 = vadd.f32 %v3365_v19, %v516_v26  ;;  %v827_v31 = vsel %vm826_vm4, %v2486_v5, %v823_v29  ;;  %v683_v47 = vpop.f32.mrf.mxu2  ;;  %v861_v20 = vor.u32 1.1754944e-38, %v860_v6 }
 0x126   :  { %v2492_v43 = vpop.eup %2491  ;;  %v832_v45 = vsel %vm829_vm5, %v831_v17, %v827_v31  ;;  %v3389_v37 = vadd.f32 %v3343_v61, %v683_v47  ;;  %vm859_vm13 = vcmp.eq.f32.partialorder %v858_v18, 8.507059e+37 }
 0x127   :  { %564 = vst [vmem:[#allocation2] sm:$0xff] %v517_v25  ;;  %2305 = vmatmul.msk.f32.gmra.mxu0 %vm62_vm0, %v2289_v27  ;;  %2338 = vmatmul.msk.f32.vlgmr.msrb.gmra.mxu1 %vm62_vm0, %v2322_v28  ;;  %v835_v44 = vmul.f32 %v2492_v43, %v3357_v13  ;;  %v1017_v48 = vmul.f32 %v832_v45, %v3266_v2  ;;  %vm840_vm7 = vweird.f32 %v2492_v43 }
 0x128   :  { %v2494_v51 = vpop.eup %2493  ;;  %v2265_v54 = vmul.f32 -1.442695, %v3389_v37  ;;  %vm841_vm8 = vmor %vm839_vm6, %vm840_vm7 }
 0x129   :  { %v836_v46 = vsub.f32 1.0, %v835_v44  ;;  %v2496_v36 = vpop.eup %2495  ;;  %v3403_v49 = vadd.f32 1.0, %v2494_v51 }
 0x12a   :  { %2497 = vpow2.f32 %v2265_v54  ;;  %v850_v42 = vmul.f32 %v2496_v36, %v3381_v32  ;;  %vm855_vm11 = vweird.f32 %v2496_v36 }
 0x12b   :  { %v837_v33 = vmul.f32 %v2492_v43, %v836_v46  ;;  %2499 = vrcp.f32 %v3403_v49  ;;  %1055 = vmatmul.f32.gmra.mxu3 %v1017_v48  ;;  %vm3425_vm12 = vmor %vm854_vm10, %vm855_vm11  ;;  %v875_v29 = vand.u32 2147483648, %v3403_v49  ;;  %vm869_vm14 = vweird.f32 %v3403_v49 }
 0x12c   :  { %v519_v30 = vpop.f32.mrf.mxu1  ;;  %v1194_v53 = vpop.f32.mrf.mxu0  ;;  %v851_v38 = vsub.f32 1.0, %v850_v42  ;;  %v873_v51 = vand.u32 2147483647, %v3403_v49 }
 0x12d   :  { %v520_v2 = vadd.f32 %v3365_v19, %v519_v30  ;;  %v3401_v10 = vadd.f32 %v3343_v61, %v1194_v53  ;;  %v838_v52 = vadd.f32 %v2492_v43, %v837_v33  ;;  %v686_v56 = vpop.f32.mrf.mxu2  ;;  %v876_v30 = vor.u32 1.1754944e-38, %v875_v29 }
 0x12e   :  { %v3410_v3 = vadd.f32 %v3343_v61, %v686_v56  ;;  %v852_v4 = vmul.f32 %v2496_v36, %v851_v38  ;;  %vm874_vm2 = vcmp.eq.f32.partialorder %v873_v51, 8.507059e+37 }
 0x12f   :  { %565 = vst [vmem:[#allocation2 + $0x8] sm:$0xff] %v520_v2  ;;  %v2306_v60 = vmul.f32 -1.442695, %v3401_v10  ;;  %2339 = vmatmul.msk.f32.gmra.mxu1 %vm62_vm0, %v2323_v35  ;;  %v842_v58 = vsel %vm841_vm8, %v2492_v43, %v838_v52  ;;  %v2325_v43 = vld [vmem:[%s4326_s0 + $0x198] sm:$0xff] }
 0x130   :  { %v847_v63 = vsel %vm844_vm9, %v846_v59, %v842_v58  ;;  %v2498_v40 = vpop.eup %2497  ;;  %v2266_v11 = vmul.f32 -1.442695, %v3410_v3  ;;  %v853_v12 = vadd.f32 %v2496_v36, %v852_v4 }
 0x131   :  { %2501 = vpow2.f32 %v2306_v60  ;;  %v1018_v5 = vmul.f32 %v847_v63, %v3310_v41  ;;  %v2500_v16 = vpop.eup %2499  ;;  %v3423_v14 = vadd.f32 1.0, %v2498_v40 }
 0x132   :  { %2503 = vpow2.f32 %v2266_v11  ;;  %v857_v39 = vsel %vm3425_vm12, %v2496_v36, %v853_v12  ;;  %v865_v7 = vmul.f32 %v2500_v16, %v3403_v49  ;;  %vm870_vm15 = vweird.f32 %v2500_v16 }
 0x133   :  { %2505 = vrcp.f32 %v3423_v14  ;;  %1058 = vmatmul.f32.gmra.mxu3 %v1018_v5  ;;  %v862_v27 = vsel %vm859_vm13, %v861_v20, %v857_v39  ;;  %vm3458_vm1 = vmor %vm869_vm14, %vm870_vm15  ;;  %v2326_v5 = vld [vmem:[%s4326_s0 + $0x1a0] sm:$0xff]  ;;  %vm884_vm8 = vweird.f32 %v3423_v14  ;;  %v890_v18 = vand.u32 2147483648, %v3423_v14 }
 0x134   :  { %v522_v8 = vpop.f32.mrf.mxu1  ;;  %v1197_v0 = vpop.f32.mrf.mxu0  ;;  %v866_v24 = vsub.f32 1.0, %v865_v7  ;;  %v1019_v31 = vmul.f32 %v862_v27, %v3346_v62 }
 0x135   :  { %v523_v13 = vadd.f32 %v3365_v19, %v522_v8  ;;  %v3421_v41 = vadd.f32 %v3343_v61, %v1197_v0  ;;  %v689_v26 = vpop.f32.mrf.mxu2 }
 0x136   :  { %v3440_v28 = vadd.f32 %v3343_v61, %v689_v26  ;;  %v867_v15 = vmul.f32 %v2500_v16, %v866_v24 }
 0x137   :  { %v2502_v21 = vpop.eup %2501  ;;  %566 = vst [vmem:[#allocation2 + $0x10] sm:$0xff] %v523_v13  ;;  %v2307_v22 = vmul.f32 -1.442695, %v3421_v41  ;;  %2340 = vmatmul.msk.f32.gmra.mxu1 %vm62_vm0, %v2324_v9 }
 0x138   :  { %v3436_v23 = vadd.f32 1.0, %v2502_v21  ;;  %v2504_v25 = vpop.eup %2503  ;;  %v2267_v48 = vmul.f32 -1.442695, %v3440_v28  ;;  %v868_v50 = vadd.f32 %v2500_v16, %v867_v15  ;;  %v888_v21 = vand.u32 2147483647, %v3423_v14 }
 0x139   :  { %2507 = vpow2.f32 %v2307_v22  ;;  %v3449_v44 = vpop.eup %2505  ;;  %v3455_v46 = vadd.f32 1.0, %v2504_v25 }
 0x13a   :  { %2509 = vrcp.f32 %v3436_v23  ;;  %v1315_v32 = vand.u32 2147483647, %v3436_v23  ;;  %v1317_v62 = vand.u32 2147483648, %v3436_v23  ;;  %v880_v54 = vmul.f32 %v3449_v44, %v3423_v14 }
 0x13b   :  { %2511 = vrcp.f32 %v3455_v46  ;;  %1061 = vmatmul.f32.gmra.mxu3 %v1019_v31  ;;  %v872_v2 = vsel %vm3458_vm1, %v2500_v16, %v868_v50  ;;  %vm1311_vm3 = vweird.f32 %v3436_v23  ;;  %vm885_vm9 = vweird.f32 %v3449_v44  ;;  %v2327_v50 = vld [vmem:[%s4326_s0 + $0x1a8] sm:$0xff] }
 0x13c   :  { %v525_v34 = vpop.f32.mrf.mxu1  ;;  %v1200_v17 = vpop.f32.mrf.mxu0  ;;  %2513 = vpow2.f32 %v2267_v48  ;;  %v877_v59 = vsel %vm874_vm2, %v876_v30, %v872_v2  ;;  %vm3475_vm4 = vcmp.eq.f32.partialorder %v1315_v32, 8.507059e+37  ;;  %v1318_v60 = vor.u32 1.1754944e-38, %v1317_v62  ;;  %vm3529_vm11 = vmor %vm884_vm8, %vm885_vm9 }
 0x13d   :  { %v526_v45 = vadd.f32 %v3365_v19, %v525_v34  ;;  %v3453_v47 = vadd.f32 %v3343_v61, %v1200_v17  ;;  %v692_v52 = vpop.f32.mrf.mxu2  ;;  %v881_v38 = vsub.f32 1.0, %v880_v54  ;;  %v1020_v8 = vmul.f32 %v877_v59, %v3368_v57 }
 0x13e   :  { %v3481_v63 = vadd.f32 %v3343_v61, %v692_v52  ;;  %v891_v31 = vor.u32 1.1754944e-38, %v890_v18  ;;  %vm3537_vm13 = vcmp.eq.f32.partialorder %v888_v21, 8.507059e+37  ;;  %vm899_vm2 = vweird.f32 %v3455_v46 }
 0x13f   :  { %v2508_v53 = vpop.eup %2507  ;;  %567 = vst [vmem:[#allocation2 + $0x18] sm:$0xff] %v526_v45  ;;  %v2308_v35 = vmul.f32 -1.442695, %v3453_v47  ;;  %2341 = vmatmul.msk.f32.gmra.mxu1 %vm62_vm0, %v2325_v43  ;;  %v882_v57 = vmul.f32 %v3449_v44, %v881_v38  ;;  %v905_v34 = vand.u32 2147483648, %v3455_v46 }
 0x140   :  { %v2510_v55 = vpop.eup %2509  ;;  %v3469_v36 = vadd.f32 1.0, %v2508_v53  ;;  %v2268_v16 = vmul.f32 -1.442695, %v3481_v63 }
 0x141   :  { %v1307_v49 = vmul.f32 %v2510_v55, %v3436_v23  ;;  %2515 = vpow2.f32 %v2308_v35  ;;  %vm1312_vm5 = vweird.f32 %v2510_v55  ;;  %v3490_v0 = vpop.eup %2511  ;;  %v883_v26 = vadd.f32 %v3449_v44, %v882_v57 }
 0x142   :  { %2517 = vrcp.f32 %v3469_v36  ;;  %vm1326_vm6 = vweird.f32 %v3469_v36  ;;  %v1330_v6 = vand.u32 2147483647, %v3469_v36  ;;  %v1332_v40 = vand.u32 2147483648, %v3469_v36  ;;  %v2514_v13 = vpop.eup %2513  ;;  %vm3500_vm7 = vmor %vm1311_vm3, %vm1312_vm5 }
 0x143   :  { %v1308_v58 = vsub.f32 1.0, %v1307_v49  ;;  %2519 = vpow2.f32 %v2268_v16  ;;  %1064 = vmatmul.f32.gmra.mxu3 %v1020_v8  ;;  %v895_v27 = vmul.f32 %v3490_v0, %v3455_v46  ;;  %v3523_v25 = vadd.f32 1.0, %v2514_v13 }
 0x144   :  { %v528_v56 = vpop.f32.mrf.mxu1  ;;  %v1203_v4 = vpop.f32.mrf.mxu0  ;;  %vm3513_vm10 = vcmp.eq.f32.partialorder %v1330_v6, 8.507059e+37  ;;  %v1333_v43 = vor.u32 1.1754944e-38, %v1332_v40  ;;  %vm900_vm3 = vweird.f32 %v3490_v0 }
 0x145   :  { %v1309_v9 = vmul.f32 %v2510_v55, %v1308_v58  ;;  %v529_v11 = vadd.f32 %v3365_v19, %v528_v56  ;;  %v3494_v12 = vadd.f32 %v3343_v61, %v1203_v4  ;;  %v695_v32 = vpop.f32.mrf.mxu2  ;;  %v896_v53 = vsub.f32 1.0, %v895_v27 }
 0x146   :  { %v3546_v30 = vadd.f32 %v3343_v61, %v695_v32  ;;  %v903_v27 = vand.u32 2147483647, %v3455_v46 }
 0x147   :  { %v2516_v39 = vpop.eup %2515  ;;  %v1310_v20 = vadd.f32 %v2510_v55, %v1309_v9  ;;  %568 = vst [vmem:[#allocation2 + $0x20] sm:$0xff] %v529_v11  ;;  %v2309_v7 = vmul.f32 -1.442695, %v3494_v12  ;;  %2342 = vmatmul.msk.f32.gmra.mxu1 %vm62_vm0, %v2326_v5  ;;  %v897_v59 = vmul.f32 %v3490_v0, %v896_v53 }
 0x148   :  { %v2518_v22 = vpop.eup %2517  ;;  %v3511_v23 = vadd.f32 1.0, %v2516_v39  ;;  %v2269_v58 = vmul.f32 -1.442695, %v3546_v30  ;;  %vm904_vm9 = vcmp.eq.f32.partialorder %v903_v27, 8.507059e+37 }
 0x149   :  { %v1314_v15 = vsel %vm3500_vm7, %v2510_v55, %v1310_v20  ;;  %2521 = vpow2.f32 %v2309_v7  ;;  %v1322_v29 = vmul.f32 %v2518_v22, %v3469_v36  ;;  %vm1327_vm12 = vweird.f32 %v2518_v22  ;;  %v2520_v35 = vpop.eup %2519  ;;  %v2328_v20 = vld [vmem:[%s4326_s0 + $0x1b0] sm:$0xff] }
 0x14a   :  { %v1319_v17 = vsel %vm3475_vm4, %v1318_v60, %v1314_v15  ;;  %2523 = vrcp.f32 %v3511_v23  ;;  %v1345_v51 = vand.u32 2147483647, %v3511_v23  ;;  %vm3559_vm14 = vmor %vm1326_vm6, %vm1327_vm12  ;;  %vm1341_vm15 = vweird.f32 %v3511_v23 }
 0x14b   :  { %v1546_v45 = vmul.f32 %v1319_v17, %v3401_v10  ;;  %v1323_v48 = vsub.f32 1.0, %v1322_v29  ;;  %v887_v10 = vsel %vm3529_vm11, %v3449_v44, %v883_v26  ;;  %2525 = vrcp.f32 %v3523_v25  ;;  %vm3605_vm6 = vmor %vm899_vm2, %vm900_vm3 }
 0x14c   :  { %v531_v14 = vpop.f32.mrf.mxu1  ;;  %v1206_v62 = vpop.f32.mrf.mxu0  ;;  %v1347_v44 = vand.u32 2147483648, %v3511_v23  ;;  %v892_v52 = vsel %vm3537_vm13, %v891_v31, %v887_v10  ;;  %vm3574_vm1 = vcmp.eq.f32.partialorder %v1345_v51, 8.507059e+37  ;;  %v3578_v6 = vadd.f32 1.0, %v2520_v35 }
 0x14d   :  { %v532_v54 = vadd.f32 %v3365_v19, %v531_v14  ;;  %v3553_v55 = vadd.f32 %v3343_v61, %v1206_v62  ;;  %1578 = vmatmul.f32.vlgmr.msrb.gmra.mxu2 %v1546_v45  ;;  %v1324_v2 = vmul.f32 %v2518_v22, %v1323_v48  ;;  %v1021_v38 = vmul.f32 %v892_v52, %v3389_v37  ;;  %v698_v9 = vpop.f32.mrf.mxu2 }
 0x14e   :  { %v898_v11 = vadd.f32 %v3490_v0, %v897_v59  ;;  %v1348_v7 = vor.u32 1.1754944e-38, %v1347_v44  ;;  %v3599_v21 = vadd.f32 %v3343_v61, %v698_v9  ;;  %v906_v14 = vor.u32 1.1754944e-38, %v905_v34 }
 0x14f   :  { %v2522_v42 = vpop.eup %2521  ;;  %569 = vst [vmem:[#allocation2 + $0x28] sm:$0xff] %v532_v54  ;;  %v2310_v60 = vmul.f32 -1.442695, %v3553_v55  ;;  %2343 = vmatmul.msk.f32.gmra.mxu1 %vm62_vm0, %v2327_v50  ;;  %v1325_v36 = vadd.f32 %v2518_v22, %v1324_v2  ;;  %1067 = vmatmul.f32.gmra.mxu3 %v1021_v38 }
 0x150   :  { %v2524_v56 = vpop.eup %2523  ;;  %v3572_v4 = vadd.f32 1.0, %v2522_v42  ;;  %v2270_v32 = vmul.f32 -1.442695, %v3599_v21  ;;  %v902_v48 = vsel %vm3605_vm6, %v3490_v0, %v898_v11  ;;  %v2329_v42 = vld [vmem:[%s4326_s0 + $0x1b8] sm:$0xff] }
 0x151   :  { %2527 = vpow2.f32 %v2310_v60  ;;  %v1329_v40 = vsel %vm3559_vm14, %v2518_v22, %v1325_v36  ;;  %v1337_v8 = vmul.f32 %v2524_v56, %v3511_v23  ;;  %vm1342_vm4 = vweird.f32 %v2524_v56  ;;  %v3589_v16 = vpop.eup %2525 }
 0x152   :  { %2529 = vrcp.f32 %v3572_v4  ;;  %v1334_v37 = vsel %vm3513_vm10, %v1333_v43, %v1329_v40  ;;  %v1360_v57 = vand.u32 2147483647, %v3572_v4  ;;  %vm1356_vm5 = vweird.f32 %v3572_v4  ;;  %vm3617_vm7 = vmor %vm1341_vm15, %vm1342_vm4 }
 0x153   :  { %v1547_v13 = vmul.f32 %v1334_v37, %v3421_v41  ;;  %v1338_v1 = vsub.f32 1.0, %v1337_v8  ;;  %2531 = vpow2.f32 %v2269_v58  ;;  %v1362_v29 = vand.u32 2147483648, %v3572_v4 }
 0x154   :  { %v534_v18 = vpop.f32.mrf.mxu1  ;;  %v1209_v39 = vpop.f32.mrf.mxu0  ;;  %2533 = vrcp.f32 %v3578_v6  ;;  %v910_v17 = vmul.f32 %v3589_v16, %v3523_v25  ;;  %vm3628_vm8 = vcmp.eq.f32.partialorder %v1360_v57, 8.507059e+37  ;;  %vm914_vm10 = vweird.f32 %v3523_v25 }
 0x155   :  { %v535_v22 = vadd.f32 %v3365_v19, %v534_v18  ;;  %v3611_v24 = vadd.f32 %v3343_v61, %v1209_v39  ;;  %1581 = vmatmul.f32.gmra.mxu2 %v1547_v13  ;;  %v1339_v26 = vmul.f32 %v2524_v56, %v1338_v1  ;;  %2535 = vpow2.f32 %v2270_v32  ;;  %v701_v53 = vpop.f32.mrf.mxu2 }
 0x156   :  { %v911_v62 = vsub.f32 1.0, %v910_v17  ;;  %v1363_v54 = vor.u32 1.1754944e-38, %v1362_v29  ;;  %v907_v60 = vsel %vm904_vm9, %v906_v14, %v902_v48  ;;  %v3653_v36 = vadd.f32 %v3343_v61, %v701_v53 }
 0x157   :  { %v2528_v43 = vpop.eup %2527  ;;  %570 = vst [vmem:[#allocation2 + $0x30] sm:$0xff] %v535_v22  ;;  %v2311_v31 = vmul.f32 -1.442695, %v3611_v24  ;;  %2344 = vmatmul.msk.f32.gmra.mxu1 %vm62_vm0, %v2328_v20  ;;  %v1340_v23 = vadd.f32 %v2524_v56, %v1339_v26  ;;  %vm915_vm12 = vweird.f32 %v3589_v16  ;;  %v1022_v37 = vmul.f32 %v907_v60, %v3410_v3 }
 0x158   :  { %v2530_v33 = vpop.eup %2529  ;;  %v3635_v46 = vadd.f32 1.0, %v2528_v43  ;;  %v912_v58 = vmul.f32 %v3589_v16, %v911_v62  ;;  %v2271_v11 = vmul.f32 -1.442695, %v3653_v36  ;;  %vm3683_vm15 = vmor %vm914_vm10, %vm915_vm12  ;;  %v918_v20 = vand.u32 2147483647, %v3523_v25 }
 0x159   :  { %v2532_v50 = vpop.eup %2531  ;;  %2537 = vpow2.f32 %v2311_v31  ;;  %v1344_v51 = vsel %vm3617_vm7, %v2524_v56, %v1340_v23  ;;  %v1352_v10 = vmul.f32 %v2530_v33, %v3572_v4  ;;  %vm1357_vm11 = vweird.f32 %v2530_v33  ;;  %1070 = vmatmul.f32.gmra.mxu3 %v1022_v37  ;;  %v2330_v23 = vld [vmem:[%s4326_s0 + $0x1c0] sm:$0xff] }
 0x15a   :  { %v3640_v35 = vpop.eup %2533  ;;  %2539 = vrcp.f32 %v3635_v46  ;;  %v1349_v0 = vsel %vm3574_vm1, %v1348_v7, %v1344_v51  ;;  %v3647_v44 = vadd.f32 1.0, %v2532_v50  ;;  %v1375_v5 = vand.u32 2147483647, %v3635_v46  ;;  %vm3665_vm13 = vmor %vm1356_vm5, %vm1357_vm11 }
 0x15b   :  { %v1548_v2 = vmul.f32 %v1349_v0, %v3453_v47  ;;  %v1353_v49 = vsub.f32 1.0, %v1352_v10  ;;  %v2536_v40 = vpop.eup %2535  ;;  %vm1371_vm14 = vweird.f32 %v3635_v46  ;;  %v1377_v9 = vand.u32 2147483648, %v3635_v46 }
 0x15c   :  { %v537_v52 = vpop.f32.mrf.mxu1  ;;  %v1212_v59 = vpop.f32.mrf.mxu0  ;;  %2541 = vrcp.f32 %v3647_v44  ;;  %v913_v4 = vadd.f32 %v3589_v16, %v912_v58  ;;  %v920_v7 = vand.u32 2147483648, %v3523_v25  ;;  %vm3692_vm1 = vcmp.eq.f32.partialorder %v1375_v5, 8.507059e+37 }
 0x15d   :  { %v538_v47 = vadd.f32 %v3365_v19, %v537_v52  ;;  %v3659_v38 = vadd.f32 %v3343_v61, %v1212_v59  ;;  %1584 = vmatmul.f32.gmra.mxu2 %v1548_v2  ;;  %v1354_v56 = vmul.f32 %v2530_v33, %v1353_v49  ;;  %2543 = vpow2.f32 %v2271_v11  ;;  %v704_v27 = vpop.f32.mrf.mxu2 }
 0x15e   :  { %v1378_v29 = vor.u32 1.1754944e-38, %v1377_v9  ;;  %v3699_v32 = vadd.f32 1.0, %v2536_v40  ;;  %v917_v17 = vsel %vm3683_vm15, %v3589_v16, %v913_v4  ;;  %vm919_vm3 = vcmp.eq.f32.partialorder %v918_v20, 8.507059e+37 }
 0x15f   :  { %v2538_v13 = vpop.eup %2537  ;;  %571 = vst [vmem:[#allocation2 + $0x38] sm:$0xff] %v538_v47  ;;  %v2312_v1 = vmul.f32 -1.442695, %v3659_v38  ;;  %2345 = vmatmul.msk.f32.gmra.mxu1 %vm62_vm0, %v2329_v42  ;;  %v1355_v57 = vadd.f32 %v2530_v33, %v1354_v56  ;;  %v921_v48 = vor.u32 1.1754944e-38, %v920_v7  ;;  %v925_v0 = vmul.f32 %v3640_v35, %v3578_v6 }
 0x160   :  { %v2540_v18 = vpop.eup %2539  ;;  %v3677_v39 = vadd.f32 1.0, %v2538_v13  ;;  %vm929_vm7 = vweird.f32 %v3578_v6  ;;  %v933_v3 = vand.u32 2147483647, %v3578_v6 }
 0x161   :  { %2545 = vpow2.f32 %v2312_v1  ;;  %v1359_v41 = vsel %vm3665_vm13, %v2530_v33, %v1355_v57  ;;  %v1367_v22 = vmul.f32 %v2540_v18, %v3635_v46  ;;  %vm1372_vm2 = vweird.f32 %v2540_v18  ;;  %v2331_v57 = vld [vmem:[%s4326_s0 + $0x1c8] sm:$0xff] }
 0x162   :  { %2547 = vrcp.f32 %v3677_v39  ;;  %v1364_v15 = vsel %vm3628_vm8, %v1363_v54, %v1359_v41  ;;  %v1390_v45 = vand.u32 2147483647, %v3677_v39  ;;  %v3710_v33 = vadd.f32 %v3343_v61, %v704_v27  ;;  %vm3722_vm5 = vmor %vm1371_vm14, %vm1372_vm2 }
 0x163   :  { %v1549_v25 = vmul.f32 %v1364_v15, %v3494_v12  ;;  %v1368_v34 = vsub.f32 1.0, %v1367_v22  ;;  %v3712_v12 = vpop.eup %2541  ;;  %vm1386_vm4 = vweird.f32 %v3677_v39  ;;  %2549 = vrcp.f32 %v3699_v32 }
 0x164   :  { %v540_v43 = vpop.f32.mrf.mxu1  ;;  %v1215_v31 = vpop.f32.mrf.mxu0  ;;  %v922_v10 = vsel %vm919_vm3, %v921_v48, %v917_v17  ;;  %v2272_v53 = vmul.f32 -1.442695, %v3710_v33  ;;  %v1392_v46 = vand.u32 2147483648, %v3677_v39  ;;  %vm3736_vm6 = vcmp.eq.f32.partialorder %v1390_v45, 8.507059e+37 }
 0x165   :  { %v541_v14 = vadd.f32 %v3365_v19, %v540_v43  ;;  %v3716_v62 = vadd.f32 %v3343_v61, %v1215_v31  ;;  %1587 = vmatmul.f32.gmra.mxu2 %v1549_v25  ;;  %v1369_v16 = vmul.f32 %v2540_v18, %v1368_v34  ;;  %v2544_v50 = vpop.eup %2543  ;;  %v1023_v52 = vmul.f32 %v922_v10, %v3440_v28  ;;  %v707_v37 = vpop.f32.mrf.mxu2 }
 0x166   :  { %2551 = vpow2.f32 %v2272_v53  ;;  %v926_v58 = vsub.f32 1.0, %v925_v0  ;;  %v3747_v5 = vadd.f32 1.0, %v2544_v50  ;;  %vm930_vm8 = vweird.f32 %v3640_v35 }
 0x167   :  { %v2546_v54 = vpop.eup %2545  ;;  %572 = vst [vmem:[#allocation2 + $0x40] sm:$0xff] %v541_v14  ;;  %v2313_v2 = vmul.f32 -1.442695, %v3716_v62  ;;  %2346 = vmatmul.msk.f32.gmra.mxu1 %vm62_vm0, %v2330_v23  ;;  %v1370_v49 = vadd.f32 %v2540_v18, %v1369_v16  ;;  %1073 = vmatmul.f32.gmra.mxu3 %v1023_v52  ;;  %v1393_v9 = vor.u32 1.1754944e-38, %v1392_v46  ;;  %vm3769_vm11 = vmor %vm929_vm7, %vm930_vm8  ;;  %v3783_v25 = vadd.f32 %v3343_v61, %v707_v37  ;;  %v2332_v52 = vld [vmem:[%s4326_s0 + $0x1d0] sm:$0xff] }
 0x168   :  { %v2548_v59 = vpop.eup %2547  ;;  %v3734_v42 = vadd.f32 1.0, %v2546_v54  ;;  %vm934_vm13 = vcmp.eq.f32.partialorder %v933_v3, 8.507059e+37  ;;  %v940_v48 = vmul.f32 %v3712_v12, %v3647_v44  ;;  %vm945_vm2 = vweird.f32 %v3712_v12 }
 0x169   :  { %2553 = vpow2.f32 %v2313_v2  ;;  %v1374_v47 = vsel %vm3722_vm5, %v2540_v18, %v1370_v49  ;;  %v1382_v56 = vmul.f32 %v2548_v59, %v3677_v39  ;;  %vm1387_vm9 = vweird.f32 %v2548_v59  ;;  %v3751_v11 = vpop.eup %2549 }
 0x16a   :  { %2555 = vrcp.f32 %v3734_v42  ;;  %v1379_v28 = vsel %vm3692_vm1, %v1378_v29, %v1374_v47  ;;  %v1405_v4 = vand.u32 2147483647, %v3734_v42  ;;  %v927_v18 = vmul.f32 %v3640_v35, %v926_v58  ;;  %vm3776_vm12 = vmor %vm1386_vm4, %vm1387_vm9 }
 0x16b   :  { %v1550_v40 = vmul.f32 %v1379_v28, %v3553_v55  ;;  %v1383_v8 = vsub.f32 1.0, %v1382_v56  ;;  %v935_v55 = vand.u32 2147483648, %v3578_v6  ;;  %vm1401_vm10 = vweird.f32 %v3734_v42 }
 0x16c   :  { %v543_v13 = vpop.f32.mrf.mxu1  ;;  %v1218_v1 = vpop.f32.mrf.mxu0  ;;  %2557 = vrcp.f32 %v3747_v5  ;;  %v928_v15 = vadd.f32 %v3640_v35, %v927_v18  ;;  %v1407_v39 = vand.u32 2147483648, %v3734_v42  ;;  %vm3790_vm14 = vcmp.eq.f32.partialorder %v1405_v4, 8.507059e+37  ;;  %v2334_v18 = vld [vmem:[%s4326_s0 + $0x1e0] sm:$0xff] }
 0x16d   :  { %v544_v20 = vadd.f32 %v3365_v19, %v543_v13  ;;  %v3762_v7 = vadd.f32 %v3343_v61, %v1218_v1  ;;  %1590 = vmatmul.f32.gmra.mxu2 %v1550_v40  ;;  %v1384_v41 = vmul.f32 %v2548_v59, %v1383_v8  ;;  %v2552_v26 = vpop.eup %2551  ;;  %v936_v29 = vor.u32 1.1754944e-38, %v935_v55 }
 0x16e   :  { %v932_v45 = vsel %vm3769_vm11, %v3640_v35, %v928_v15  ;;  %v3802_v50 = vadd.f32 1.0, %v2552_v26  ;;  %v2273_v53 = vmul.f32 -1.442695, %v3783_v25  ;;  %v941_v58 = vsub.f32 1.0, %v940_v48 }
 0x16f   :  { %v2554_v6 = vpop.eup %2553  ;;  %573 = vst [vmem:[#allocation2 + $0x48] sm:$0xff] %v544_v20  ;;  %v2314_v34 = vmul.f32 -1.442695, %v3762_v7  ;;  %2347 = vmatmul.msk.f32.gmra.mxu1 %vm62_vm0, %v2331_v57  ;;  %v1385_v17 = vadd.f32 %v2548_v59, %v1384_v41  ;;  %v937_v10 = vsel %vm934_vm13, %v936_v29, %v932_v45  ;;  %vm944_vm1 = vweird.f32 %v3647_v44 }
 0x170   :  { %v2556_v43 = vpop.eup %2555  ;;  %v3788_v31 = vadd.f32 1.0, %v2554_v6  ;;  %v1024_v54 = vmul.f32 %v937_v10, %v3481_v63  ;;  %v1408_v28 = vor.u32 1.1754944e-38, %v1407_v39  ;;  %v942_v40 = vmul.f32 %v3712_v12, %v941_v58 }
 0x171   :  { %2559 = vpow2.f32 %v2314_v34  ;;  %v1389_v14 = vsel %vm3776_vm12, %v2548_v59, %v1385_v17  ;;  %v1397_v16 = vmul.f32 %v2556_v43, %v3734_v42  ;;  %vm1402_vm15 = vweird.f32 %v2556_v43 }
 0x172   :  { %2561 = vrcp.f32 %v3788_v31  ;;  %v1394_v51 = vsel %vm3736_vm6, %v1393_v9, %v1389_v14  ;;  %v3810_v2 = vpop.eup %2557  ;;  %v1420_v59 = vand.u32 2147483647, %v3788_v31  ;;  %v1422_v60 = vand.u32 2147483648, %v3788_v31  ;;  %1076 = vmatmul.f32.gmra.mxu3 %v1024_v54  ;;  %vm3826_vm3 = vmor %vm1401_vm10, %vm1402_vm15 }
 0x173   :  { %v1551_v35 = vmul.f32 %v1394_v51, %v3611_v24  ;;  %v1398_v0 = vsub.f32 1.0, %v1397_v16  ;;  %2563 = vrcp.f32 %v3802_v50  ;;  %v948_v8 = vand.u32 2147483647, %v3647_v44  ;;  %vm3847_vm6 = vmor %vm944_vm1, %vm945_vm2 }
 0x174   :  { %v546_v49 = vpop.f32.mrf.mxu1  ;;  %v1221_v46 = vpop.f32.mrf.mxu0  ;;  %vm1416_vm4 = vweird.f32 %v3788_v31  ;;  %2565 = vpow2.f32 %v2273_v53  ;;  %vm3838_vm5 = vcmp.eq.f32.partialorder %v1420_v59, 8.507059e+37  ;;  %v943_v4 = vadd.f32 %v3712_v12, %v942_v40 }
 0x175   :  { %v547_v24 = vadd.f32 %v3365_v19, %v546_v49  ;;  %v3820_v47 = vadd.f32 %v3343_v61, %v1221_v46  ;;  %1593 = vmatmul.f32.gmra.mxu2 %v1551_v35  ;;  %v1399_v63 = vmul.f32 %v2556_v43, %v1398_v0  ;;  %v950_v3 = vand.u32 2147483648, %v3647_v44 }
 0x176   :  { %v1423_v41 = vor.u32 1.1754944e-38, %v1422_v60  ;;  %vm3856_vm7 = vcmp.eq.f32.partialorder %v948_v8, 8.507059e+37  ;;  %v955_v26 = vmul.f32 %v3751_v11, %v3699_v32  ;;  %vm959_vm8 = vweird.f32 %v3699_v32 }
 0x177   :  { %v2560_v9 = vpop.eup %2559  ;;  %574 = vst [vmem:[#allocation2 + $0x50] sm:$0xff] %v547_v24  ;;  %v2315_v37 = vmul.f32 -1.442695, %v3820_v47  ;;  %2348 = vmatmul.msk.f32.gmra.mxu1 %vm62_vm0, %v2332_v52  ;;  %v1400_v13 = vadd.f32 %v2556_v43, %v1399_v63  ;;  %v947_v15 = vsel %vm3847_vm6, %v3712_v12, %v943_v4  ;;  %v951_v23 = vor.u32 1.1754944e-38, %v950_v3 }
 0x178   :  { %v2562_v42 = vpop.eup %2561  ;;  %v3836_v1 = vadd.f32 1.0, %v2560_v9  ;;  %v956_v10 = vsub.f32 1.0, %v955_v26  ;;  %vm960_vm12 = vweird.f32 %v3751_v11  ;;  %v963_v53 = vand.u32 2147483647, %v3699_v32 }
 0x179   :  { %2567 = vpow2.f32 %v2315_v37  ;;  %v1404_v55 = vsel %vm3826_vm3, %v2556_v43, %v1400_v13  ;;  %v1412_v20 = vmul.f32 %v2562_v42, %v3788_v31  ;;  %vm1417_vm9 = vweird.f32 %v2562_v42  ;;  %v3868_v29 = vpop.eup %2563  ;;  %v2333_v43 = vld [vmem:[%s4326_s0 + $0x1d8] sm:$0xff]  ;;  %vm3915_vm15 = vmor %vm959_vm8, %vm960_vm12 }
 0x17a   :  { %2569 = vrcp.f32 %v3836_v1  ;;  %v1409_v44 = vsel %vm3790_vm14, %v1408_v28, %v1404_v55  ;;  %vm1431_vm10 = vweird.f32 %v3836_v1  ;;  %v1435_v6 = vand.u32 2147483647, %v3836_v1  ;;  %v2566_v45 = vpop.eup %2565  ;;  %vm3884_vm11 = vmor %vm1416_vm4, %vm1417_vm9 }
 0x17b   :  { %v1413_v27 = vsub.f32 1.0, %v1412_v20  ;;  %v1552_v39 = vmul.f32 %v1409_v44, %v3659_v38  ;;  %v1437_v48 = vand.u32 2147483648, %v3836_v1  ;;  %v952_v51 = vsel %vm3856_vm7, %v951_v23, %v947_v15  ;;  %v3936_v20 = vld [vmem:[%s4328_s2] ss:$0 sm:$0xff] }
 0x17c   :  { %v549_v34 = vpop.f32.mrf.mxu1  ;;  %v1224_v17 = vpop.f32.mrf.mxu0  ;;  %v1025_v31 = vmul.f32 %v952_v51, %v3546_v30  ;;  %v965_v54 = vand.u32 2147483648, %v3699_v32  ;;  %v3898_v52 = vadd.f32 1.0, %v2566_v45  ;;  %v957_v59 = vmul.f32 %v3751_v11, %v956_v10 }
 0x17d   :  { %v550_v12 = vadd.f32 %v3365_v19, %v549_v34  ;;  %v3879_v14 = vadd.f32 %v3343_v61, %v1224_v17  ;;  %v1414_v16 = vmul.f32 %v2562_v42, %v1413_v27  ;;  %1596 = vmatmul.f32.gmra.mxu2 %v1552_v39  ;;  %v970_v60 = vmul.f32 %v3810_v2, %v3747_v5 }
 0x17e   :  { %vm3904_vm13 = vcmp.eq.f32.partialorder %v1435_v6, 8.507059e+37  ;;  %1079 = vmatmul.f32.gmra.mxu3 %v1025_v31  ;;  %v1438_v63 = vor.u32 1.1754944e-38, %v1437_v48  ;;  %vm3919_vm1 = vcmp.eq.f32.partialorder %v963_v53, 8.507059e+37  ;;  %v958_v9 = vadd.f32 %v3751_v11, %v957_v59 }
 0x17f   :  { %v2568_v35 = vpop.eup %2567  ;;  %575 = vst [vmem:[#allocation2 + $0x58] sm:$0xff] %v550_v12  ;;  %v2316_v61 = vmul.f32 -1.442695, %v3879_v14  ;;  %2349 = vmatmul.msk.f32.gmra.mxu1 %vm62_vm0, %v2333_v43  ;;  %v1415_v0 = vadd.f32 %v2562_v42, %v1414_v16  ;;  %v966_v37 = vor.u32 1.1754944e-38, %v965_v54  ;;  %v971_v3 = vsub.f32 1.0, %v970_v60 }
 0x180   :  { %v2570_v49 = vpop.eup %2569  ;;  %v3896_v46 = vadd.f32 1.0, %v2568_v35  ;;  %vm974_vm3 = vweird.f32 %v3747_v5  ;;  %vm975_vm4 = vweird.f32 %v3810_v2  ;;  %v978_v15 = vand.u32 2147483647, %v3747_v5 }
 0x181   :  { %v1427_v58 = vmul.f32 %v2570_v49, %v3836_v1  ;;  %2571 = vpow2.f32 %v2316_v61  ;;  %v1419_v30 = vsel %vm3884_vm11, %v2562_v42, %v1415_v0  ;;  %vm1432_vm14 = vweird.f32 %v2570_v49  ;;  %v2335_v61 = vld [vmem:[%s4326_s0 + $0x1e8] sm:$0xff] }
 0x182   :  { %2573 = vrcp.f32 %v3896_v46  ;;  %v1424_v8 = vsel %vm3838_vm5, %v1423_v41, %v1419_v30  ;;  %v1450_v13 = vand.u32 2147483647, %v3896_v46  ;;  %vm3947_vm2 = vmor %vm1431_vm10, %vm1432_vm14  ;;  %v972_v26 = vmul.f32 %v3810_v2, %v971_v3 }
 0x183   :  { %v1428_v40 = vsub.f32 1.0, %v1427_v58  ;;  %v1553_v32 = vmul.f32 %v1424_v8, %v3716_v62  ;;  %2575 = vrcp.f32 %v3898_v52  ;;  %v962_v62 = vsel %vm3915_vm15, %v3751_v11, %v958_v9  ;;  %vm3963_vm5 = vmor %vm974_vm3, %vm975_vm4 }
 0x184   :  { %v552_v42 = vpop.f32.mrf.mxu1  ;;  %v1227_v4 = vpop.f32.mrf.mxu0  ;;  %v973_v17 = vadd.f32 %v3810_v2, %v972_v26  ;;  %v980_v43 = vand.u32 2147483648, %v3747_v5  ;;  %v985_v23 = vmul.f32 %v3868_v29, %v3802_v50  ;;  %v1452_v48 = vand.u32 2147483648, %v3896_v46 }
 0x185   :  { %v1429_v55 = vmul.f32 %v2570_v49, %v1428_v40  ;;  %v553_v57 = vadd.f32 %v3365_v19, %v552_v42  ;;  %v3939_v41 = vadd.f32 %v3936_v20, %v1227_v4  ;;  %1599 = vmatmul.f32.gmra.mxu2 %v1553_v32  ;;  %v967_v19 = vsel %vm3919_vm1, %v966_v37, %v962_v62 }
 0x186   :  { %v1026_v1 = vmul.f32 %v967_v19, %v3599_v21  ;;  %vm1446_vm6 = vweird.f32 %v3896_v46  ;;  %v977_v51 = vsel %vm3963_vm5, %v3810_v2, %v973_v17  ;;  %vm3984_vm8 = vcmp.eq.f32.partialorder %v1450_v13, 8.507059e+37  ;;  %v2336_v19 = vld [vmem:[%s4326_s0 + $0x1f0] sm:$0xff] }
 0x187   :  { %v2572_v44 = vpop.eup %2571  ;;  %v1430_v27 = vadd.f32 %v2570_v49, %v1429_v55  ;;  %576 = vst [vmem:[#allocation2 + $0x60] sm:$0xff] %v553_v57  ;;  %v2317_v11 = vmul.f32 -1.442695, %v3939_v41  ;;  %2350 = vmatmul.msk.f32.gmra.mxu1 %vm62_vm0, %v2334_v18  ;;  %vm979_vm9 = vcmp.eq.f32.partialorder %v978_v15, 8.507059e+37  ;;  %v981_v0 = vor.u32 1.1754944e-38, %v980_v43 }
 0x188   :  { %v2574_v6 = vpop.eup %2573  ;;  %v3960_v34 = vadd.f32 1.0, %v2572_v44  ;;  %1082 = vmatmul.f32.gmra.mxu3 %v1026_v1  ;;  %v986_v31 = vsub.f32 1.0, %v985_v23  ;;  %v1453_v54 = vor.u32 1.1754944e-38, %v1452_v48  ;;  %vm989_vm11 = vweird.f32 %v3802_v50 }
 0x189   :  { %v1434_v45 = vsel %vm3947_vm2, %v2570_v49, %v1430_v27  ;;  %v1442_v21 = vmul.f32 %v2574_v6, %v3896_v46  ;;  %2577 = vpow2.f32 %v2317_v11  ;;  %v3974_v12 = vpop.eup %2575  ;;  %vm1447_vm7 = vweird.f32 %v2574_v6  ;;  %v3994_v49 = vld [vmem:[%s4330_s4] ss:$0 sm:$0xff] }
 0x18a   :  { %v1439_v16 = vsel %vm3904_vm13, %v1438_v63, %v1434_v45  ;;  %2579 = vrcp.f32 %v3960_v34  ;;  %vm4002_vm10 = vmor %vm1446_vm6, %vm1447_vm7  ;;  %v982_v58 = vsel %vm979_vm9, %v981_v0, %v977_v51  ;;  %v987_v24 = vmul.f32 %v3868_v29, %v986_v31 }
 0x18b   :  { %v1554_v5 = vmul.f32 %v1439_v16, %v3762_v7  ;;  %v1443_v38 = vsub.f32 1.0, %v1442_v21  ;;  %vm990_vm12 = vweird.f32 %v3868_v29  ;;  %v1027_v46 = vmul.f32 %v982_v58, %v3653_v36 }
 0x18c   :  { %v555_v53 = vpop.f32.mrf.mxu1  ;;  %v1230_v35 = vpop.f32.mrf.mxu0  ;;  %v993_v28 = vand.u32 2147483647, %v3802_v50  ;;  %v988_v9 = vadd.f32 %v3868_v29, %v987_v24  ;;  %vm4016_vm13 = vmor %vm989_vm11, %vm990_vm12  ;;  %v995_v13 = vand.u32 2147483648, %v3802_v50  ;;  %v1000_v42 = vmul.f32 %v3974_v12, %v3898_v52 }
 0x18d   :  { %v1444_v7 = vmul.f32 %v2574_v6, %v1443_v38  ;;  %v556_v2 = vadd.f32 %v3994_v49, %v555_v53  ;;  %v3998_v59 = vadd.f32 %v3936_v20, %v1230_v35  ;;  %1602 = vmatmul.f32.gmra.mxu2 %v1554_v5  ;;  %v1467_v32 = vand.u32 2147483648, %v3960_v34 }
 0x18e   :  { %vm1461_vm14 = vweird.f32 %v3960_v34  ;;  %v1465_v3 = vand.u32 2147483647, %v3960_v34  ;;  %v992_v57 = vsel %vm4016_vm13, %v3868_v29, %v988_v9  ;;  %vm994_vm1 = vcmp.eq.f32.partialorder %v993_v28, 8.507059e+37 }
 0x18f   :  { %v2578_v30 = vpop.eup %2577  ;;  %v1445_v63 = vadd.f32 %v2574_v6, %v1444_v7  ;;  %577 = vst [vmem:[#allocation2 + $0x68] sm:$0xff] %v556_v2  ;;  %v2318_v56 = vmul.f32 -1.442695, %v3998_v59  ;;  %2351 = vmatmul.msk.f32.gmra.mxu1 %vm62_vm0, %v2335_v61  ;;  %v996_v26 = vor.u32 1.1754944e-38, %v995_v13  ;;  %v1001_v44 = vsub.f32 1.0, %v1000_v42  ;;  %v2337_v2 = vld [vmem:[%s4326_s0 + $0x1f8] sm:$0xff] }
 0x190   :  { %v2580_v40 = vpop.eup %2579  ;;  %v4013_v8 = vadd.f32 1.0, %v2578_v30  ;;  %1085 = vmatmul.f32.gmra.mxu3 %v1027_v46  ;;  %v1468_v11 = vor.u32 1.1754944e-38, %v1467_v32  ;;  %vm1004_vm3 = vweird.f32 %v3898_v52  ;;  %vm1005_vm4 = vweird.f32 %v3974_v12 }
 0x191   :  { %v1449_v4 = vsel %vm4002_vm10, %v2574_v6, %v1445_v63  ;;  %v1457_v36 = vmul.f32 %v2580_v40, %v3960_v34  ;;  %2581 = vpow2.f32 %v2318_v56  ;;  %vm1462_vm15 = vweird.f32 %v2580_v40  ;;  %vm4062_vm6 = vmor %vm1004_vm3, %vm1005_vm4 }
 0x192   :  { %v1454_v18 = vsel %vm3984_vm8, %v1453_v54, %v1449_v4  ;;  %2583 = vrcp.f32 %v4013_v8  ;;  %vm4045_vm2 = vmor %vm1461_vm14, %vm1462_vm15  ;;  %v997_v15 = vsel %vm994_vm1, %v996_v26, %v992_v57  ;;  %v1002_v6 = vmul.f32 %v3974_v12, %v1001_v44 }
 0x193   :  { %v1555_v50 = vmul.f32 %v1454_v18, %v3820_v47  ;;  %v1458_v55 = vsub.f32 1.0, %v1457_v36  ;;  %vm4052_vm5 = vcmp.eq.f32.partialorder %v1465_v3, 8.507059e+37  ;;  %v1028_v23 = vmul.f32 %v997_v15, %v3710_v33 }
 0x194   :  { %v558_v62 = vpop.f32.mrf.mxu1  ;;  %v1233_v22 = vpop.f32.mrf.mxu0  ;;  %v1003_v48 = vadd.f32 %v3974_v12, %v1002_v6  ;;  %v1008_v5 = vand.u32 2147483647, %v3898_v52  ;;  %v1010_v38 = vand.u32 2147483648, %v3898_v52  ;;  %vm1476_vm7 = vweird.f32 %v4013_v8 }
 0x195   :  { %v1459_v27 = vmul.f32 %v2580_v40, %v1458_v55  ;;  %v559_v1 = vadd.f32 %v3994_v49, %v558_v62  ;;  %v4041_v47 = vadd.f32 %v3936_v20, %v1233_v22  ;;  %1605 = vmatmul.f32.gmra.mxu2 %v1555_v50  ;;  %v1480_v53 = vand.u32 2147483647, %v4013_v8 }
 0x196   :  { %v1482_v35 = vand.u32 2147483648, %v4013_v8  ;;  %v1007_v0 = vsel %vm4062_vm6, %v3974_v12, %v1003_v48  ;;  %v1047_v31 = vpop.f32.mrf.mxu3  ;;  %vm1009_vm9 = vcmp.eq.f32.partialorder %v1008_v5, 8.507059e+37  ;;  %v1011_v60 = vor.u32 1.1754944e-38, %v1010_v38 }
 0x197   :  { %v2582_v17 = vpop.eup %2581  ;;  %v1460_v39 = vadd.f32 %v2580_v40, %v1459_v27  ;;  %578 = vst [vmem:[#allocation2 + $0x70] sm:$0xff] %v559_v1  ;;  %v2319_v34 = vmul.f32 -1.442695, %v4041_v47  ;;  %2352 = vmatmul.msk.f32.gmra.mxu1 %vm62_vm0, %v2336_v19  ;;  %v1048_v58 = vadd.f32 %v3994_v49, %v1047_v31  ;;  %vm1481_vm11 = vcmp.eq.f32.partialorder %v1480_v53, 8.507059e+37 }
 0x198   :  { %v2584_v45 = vpop.eup %2583  ;;  %v4059_v21 = vadd.f32 1.0, %v2582_v17  ;;  %1088 = vmatmul.f32.gmra.mxu3 %v1028_v23  ;;  %v1483_v63 = vor.u32 1.1754944e-38, %v1482_v35  ;;  %v1012_v56 = vsel %vm1009_vm9, %v1011_v60, %v1007_v0 }
 0x199   :  { %v1464_v51 = vsel %vm4045_vm2, %v2580_v40, %v1460_v39  ;;  %v1472_v10 = vmul.f32 %v2584_v45, %v4013_v8  ;;  %2585 = vpow2.f32 %v2319_v34  ;;  %vm1477_vm8 = vweird.f32 %v2584_v45  ;;  %1096 = vst [vmem:[#allocation2 + $0x80] sm:$0xff] %v1048_v58 }
 0x19a   :  { %v1469_v33 = vsel %vm4052_vm5, %v1468_v11, %v1464_v51  ;;  %2587 = vrcp.f32 %v4059_v21  ;;  %vm4091_vm10 = vmor %vm1476_vm7, %vm1477_vm8  ;;  %v1029_v9 = vmul.f32 %v1012_v56, %v3783_v25  ;;  %vm1491_vm12 = vweird.f32 %v4059_v21 }
 0x19b   :  { %v1556_v52 = vmul.f32 %v1469_v33, %v3879_v14  ;;  %v1473_v61 = vsub.f32 1.0, %v1472_v10  ;;  %v1497_v36 = vand.u32 2147483648, %v4059_v21  ;;  %v1495_v25 = vand.u32 2147483647, %v4059_v21 }
 0x19c   :  { %v561_v7 = vpop.f32.mrf.mxu1  ;;  %v1236_v54 = vpop.f32.mrf.mxu0 }
 0x19d   :  { %v1474_v24 = vmul.f32 %v2584_v45, %v1473_v61  ;;  %v562_v14 = vadd.f32 %v3994_v49, %v561_v7  ;;  %v4087_v30 = vadd.f32 %v3936_v20, %v1236_v54  ;;  %1608 = vmatmul.f32.gmra.mxu2 %v1556_v52  ;;  %vm1496_vm14 = vcmp.eq.f32.partialorder %v1495_v25, 8.507059e+37 }
 0x19e   :  { %v1050_v3 = vpop.f32.mrf.mxu3 }
 0x19f   :  { %v2586_v46 = vpop.eup %2585  ;;  %v1475_v28 = vadd.f32 %v2584_v45, %v1474_v24  ;;  %579 = vst [vmem:[#allocation2 + $0x78] sm:$0xff] %v562_v14  ;;  %v2320_v40 = vmul.f32 -1.442695, %v4087_v30  ;;  %2353 = vmatmul.msk.f32.gmra.mxu1 %vm62_vm0, %v2337_v2  ;;  %v1051_v57 = vadd.f32 %v3994_v49, %v1050_v3 }
 0x1a0   :  { %v2588_v37 = vpop.eup %2587  ;;  %v1303_v8 = vadd.f32 1.0, %v2586_v46  ;;  %1091 = vmatmul.f32.gmra.mxu3 %v1029_v9 }
 0x1a1   :  { %v1479_v13 = vsel %vm4091_vm10, %v2584_v45, %v1475_v28  ;;  %v1487_v42 = vmul.f32 %v2588_v37, %v4059_v21  ;;  %2589 = vpow2.f32 %v2320_v40  ;;  %vm1492_vm0 = vweird.f32 %v2588_v37  ;;  %1097 = vst [vmem:[#allocation2 + $0x88] sm:$0xff] %v1051_v57 }
 0x1a2   :  { %v1484_v4 = vsel %vm1481_vm11, %v1483_v63, %v1479_v13  ;;  %2591 = vrcp.f32 %v1303_v8  ;;  %vm4112_vm13 = vmor %vm1491_vm12, %vm1492_vm0  ;;  %vm1506_vm15 = vweird.f32 %v1303_v8  ;;  %v1510_v43 = vand.u32 2147483647, %v1303_v8 }
 0x1a3   :  { %v1557_v32 = vmul.f32 %v1484_v4, %v3939_v41  ;;  %v1488_v18 = vsub.f32 1.0, %v1487_v42  ;;  %v1498_v41 = vor.u32 1.1754944e-38, %v1497_v36  ;;  %v1512_v34 = vand.u32 2147483648, %v1303_v8 }
 0x1a4   :  { %v1239_v50 = vpop.f32.mrf.mxu0  ;;  %v1726_v55 = vpop.f32.mrf.mxu1  ;;  %vm1511_vm3 = vcmp.eq.f32.partialorder %v1510_v43, 8.507059e+37 }
 0x1a5   :  { %v1489_v62 = vmul.f32 %v2588_v37, %v1488_v18  ;;  %v4107_v22 = vadd.f32 %v3936_v20, %v1239_v50  ;;  %v4110_v19 = vadd.f32 %v3936_v20, %v1726_v55  ;;  %1611 = vmatmul.f32.gmra.mxu2 %v1557_v32  ;;  %v1513_v10 = vor.u32 1.1754944e-38, %v1512_v34 }
 0x1a6   :  { %v1053_v21 = vpop.f32.mrf.mxu3 }
 0x1a7   :  { %v2590_v44 = vpop.eup %2589  ;;  %v1490_v27 = vadd.f32 %v2588_v37, %v1489_v62  ;;  %v2321_v11 = vmul.f32 -1.442695, %v4107_v22  ;;  %v2354_v1 = vmul.f32 -1.442695, %v4110_v19  ;;  %v1054_v16 = vadd.f32 %v3994_v49, %v1053_v21 }
 0x1a8   :  { %v2592_v29 = vpop.eup %2591  ;;  %v1304_v15 = vadd.f32 1.0, %v2590_v44 }
 0x1a9   :  { %v1494_v6 = vsel %vm4112_vm13, %v2588_v37, %v1490_v27  ;;  %v1502_v17 = vmul.f32 %v2592_v29, %v1303_v8  ;;  %2593 = vpow2.f32 %v2321_v11  ;;  %vm1507_vm1 = vweird.f32 %v2592_v29  ;;  %1098 = vst [vmem:[#allocation2 + $0x90] sm:$0xff] %v1054_v16 }
 0x1aa   :  { %v1499_v39 = vsel %vm1496_vm14, %v1498_v41, %v1494_v6  ;;  %2595 = vrcp.f32 %v1304_v15  ;;  %vm4126_vm2 = vmor %vm1506_vm15, %vm1507_vm1  ;;  %vm1521_vm4 = vweird.f32 %v1304_v15  ;;  %v1525_v54 = vand.u32 2147483647, %v1304_v15 }
 0x1ab   :  { %v1558_v23 = vmul.f32 %v1499_v39, %v3998_v59  ;;  %v1503_v45 = vsub.f32 1.0, %v1502_v17  ;;  %2597 = vpow2.f32 %v2354_v1  ;;  %v1527_v2 = vand.u32 2147483648, %v1304_v15 }
 0x1ac   :  { %v1729_v48 = vpop.f32.mrf.mxu1  ;;  %vm1526_vm7 = vcmp.eq.f32.partialorder %v1525_v54, 8.507059e+37 }
 0x1ad   :  { %v1504_v5 = vmul.f32 %v2592_v29, %v1503_v45  ;;  %v4123_v38 = vadd.f32 %v3936_v20, %v1729_v48  ;;  %1614 = vmatmul.f32.gmra.mxu2 %v1558_v23  ;;  %v1528_v46 = vor.u32 1.1754944e-38, %v1527_v2 }
 0x1ae   :  { %v1056_v14 = vpop.f32.mrf.mxu3 }
 0x1af   :  { %v2594_v59 = vpop.eup %2593  ;;  %v1505_v33 = vadd.f32 %v2592_v29, %v1504_v5  ;;  %v2355_v53 = vmul.f32 -1.442695, %v4123_v38  ;;  %v1057_v63 = vadd.f32 %v3994_v49, %v1056_v14 }
 0x1b0   :  { %v2596_v35 = vpop.eup %2595  ;;  %v1305_v52 = vadd.f32 1.0, %v2594_v59 }
 0x1b1   :  { %v2598_v61 = vpop.eup %2597  ;;  %v1509_v0 = vsel %vm4126_vm2, %v2592_v29, %v1505_v33  ;;  %v1517_v31 = vmul.f32 %v2596_v35, %v1304_v15  ;;  %2599 = vpow2.f32 %v2355_v53  ;;  %vm1522_vm5 = vweird.f32 %v2596_v35  ;;  %1099 = vst [vmem:[#allocation2 + $0x98] sm:$0xff] %v1057_v63 }
 0x1b2   :  { %v1514_v7 = vsel %vm1511_vm3, %v1513_v10, %v1509_v0  ;;  %2601 = vrcp.f32 %v1305_v52  ;;  %v4134_v24 = vadd.f32 1.0, %v2598_v61  ;;  %vm1523_vm6 = vmor %vm1521_vm4, %vm1522_vm5  ;;  %vm1536_vm8 = vweird.f32 %v1305_v52 }
 0x1b3   :  { %v1559_v60 = vmul.f32 %v1514_v7, %v4041_v47  ;;  %v1518_v58 = vsub.f32 1.0, %v1517_v31  ;;  %v1540_v36 = vand.u32 2147483647, %v1305_v52  ;;  %v1542_v32 = vand.u32 2147483648, %v1305_v52 }
 0x1b4   :  { %v1732_v12 = vpop.f32.mrf.mxu1  ;;  %2603 = vrcp.f32 %v4134_v24  ;;  %v1849_v45 = vand.u32 2147483648, %v4134_v24  ;;  %vm1843_vm0 = vweird.f32 %v4134_v24  ;;  %v1847_v16 = vand.u32 2147483647, %v4134_v24 }
 0x1b5   :  { %v1519_v56 = vmul.f32 %v2596_v35, %v1518_v58  ;;  %v4140_v28 = vadd.f32 %v3936_v20, %v1732_v12  ;;  %1617 = vmatmul.f32.gmra.mxu2 %v1559_v60  ;;  %v1543_v44 = vor.u32 1.1754944e-38, %v1542_v32  ;;  %vm1541_vm11 = vcmp.eq.f32.partialorder %v1540_v36, 8.507059e+37 }
 0x1b6   :  { %v1059_v50 = vpop.f32.mrf.mxu3  ;;  %v1850_v61 = vor.u32 1.1754944e-38, %v1849_v45  ;;  %vm1848_vm1 = vcmp.eq.f32.partialorder %v1847_v16, 8.507059e+37 }
 0x1b7   :  { %v2600_v47 = vpop.eup %2599  ;;  %v1520_v40 = vadd.f32 %v2596_v35, %v1519_v56  ;;  %v2356_v8 = vmul.f32 -1.442695, %v4140_v28  ;;  %v1060_v62 = vadd.f32 %v3994_v49, %v1059_v50 }
 0x1b8   :  { %v2602_v9 = vpop.eup %2601  ;;  %v4142_v37 = vadd.f32 1.0, %v2600_v47 }
 0x1b9   :  { %v1524_v13 = vsel %vm1523_vm6, %v2596_v35, %v1520_v40  ;;  %v1532_v42 = vmul.f32 %v2602_v9, %v1305_v52  ;;  %vm1537_vm9 = vweird.f32 %v2602_v9  ;;  %1100 = vst [vmem:[#allocation2 + $0xa0] sm:$0xff] %v1060_v62 }
 0x1ba   :  { %v1529_v4 = vsel %vm1526_vm7, %v1528_v46, %v1524_v13  ;;  %2605 = vrcp.f32 %v4142_v37  ;;  %v2604_v18 = vpop.eup %2603  ;;  %vm1538_vm10 = vmor %vm1536_vm8, %vm1537_vm9  ;;  %v1864_v5 = vand.u32 2147483648, %v4142_v37  ;;  %vm1858_vm15 = vweird.f32 %v4142_v37 }
 0x1bb   :  { %v1560_v25 = vmul.f32 %v1529_v4, %v4087_v30  ;;  %v1533_v3 = vsub.f32 1.0, %v1532_v42  ;;  %2607 = vpow2.f32 %v2356_v8  ;;  %v1839_v55 = vmul.f32 %v2604_v18, %v4134_v24 }
 0x1bc   :  { %v1735_v57 = vpop.f32.mrf.mxu1  ;;  %vm1844_vm12 = vweird.f32 %v2604_v18  ;;  %v1865_v7 = vor.u32 1.1754944e-38, %v1864_v5 }
 0x1bd   :  { %v1534_v26 = vmul.f32 %v2602_v9, %v1533_v3  ;;  %v4150_v41 = vadd.f32 %v3936_v20, %v1735_v57  ;;  %v1840_v27 = vsub.f32 1.0, %v1839_v55  ;;  %1620 = vmatmul.f32.gmra.mxu2 %v1560_v25  ;;  %vm4163_vm13 = vmor %vm1843_vm0, %vm1844_vm12 }
 0x1be   :  { %v1062_v48 = vpop.f32.mrf.mxu3 }
 0x1bf   :  { %v1535_v30 = vadd.f32 %v2602_v9, %v1534_v26  ;;  %v2357_v11 = vmul.f32 -1.442695, %v4150_v41  ;;  %v1841_v29 = vmul.f32 %v2604_v18, %v1840_v27  ;;  %v1063_v35 = vadd.f32 %v3994_v49, %v1062_v48 }
 0x1c0   :  { %v2606_v1 = vpop.eup %2605 }
 0x1c1   :  { %v2608_v15 = vpop.eup %2607  ;;  %v1539_v6 = vsel %vm1538_vm10, %v2602_v9, %v1535_v30  ;;  %v1854_v17 = vmul.f32 %v2606_v1, %v4142_v37  ;;  %2609 = vpow2.f32 %v2357_v11  ;;  %v1842_v43 = vadd.f32 %v2604_v18, %v1841_v29  ;;  %1101 = vst [vmem:[#allocation2 + $0xa8] sm:$0xff] %v1063_v35 }
 0x1c2   :  { %v1544_v39 = vsel %vm1541_vm11, %v1543_v44, %v1539_v6  ;;  %v4155_v34 = vadd.f32 1.0, %v2608_v15  ;;  %vm1859_vm14 = vweird.f32 %v2606_v1 }
 0x1c3   :  { %v1561_v23 = vmul.f32 %v1544_v39, %v4107_v22  ;;  %v1855_v21 = vsub.f32 1.0, %v1854_v17  ;;  %v1862_v22 = vand.u32 2147483647, %v4142_v37  ;;  %v1846_v53 = vsel %vm4163_vm13, %v2604_v18, %v1842_v43  ;;  %vm1860_vm2 = vmor %vm1858_vm15, %vm1859_vm14 }
 0x1c4   :  { %2611 = vrcp.f32 %v4155_v34  ;;  %v1738_v51 = vpop.f32.mrf.mxu1  ;;  %v1851_v2 = vsel %vm1848_vm1, %v1850_v61, %v1846_v53  ;;  %v1879_v37 = vand.u32 2147483648, %v4155_v34  ;;  %v1877_v42 = vand.u32 2147483647, %v4155_v34 }
 0x1c5   :  { %v1856_v59 = vmul.f32 %v2606_v1, %v1855_v21  ;;  %v4169_v33 = vadd.f32 %v3936_v20, %v1738_v51  ;;  %1623 = vmatmul.f32.gmra.mxu2 %v1561_v23  ;;  %vm1863_vm3 = vcmp.eq.f32.partialorder %v1862_v22, 8.507059e+37  ;;  %v2078_v56 = vmul.f32 %v1851_v2, %v4110_v19 }
 0x1c6   :  { %v1065_v63 = vpop.f32.mrf.mxu3  ;;  %vm1873_vm5 = vweird.f32 %v4155_v34  ;;  %v1880_v3 = vor.u32 1.1754944e-38, %v1879_v37  ;;  %vm1878_vm7 = vcmp.eq.f32.partialorder %v1877_v42, 8.507059e+37 }
 0x1c7   :  { %v2610_v52 = vpop.eup %2609  ;;  %v1857_v0 = vadd.f32 %v2606_v1, %v1856_v59  ;;  %v2358_v31 = vmul.f32 -1.442695, %v4169_v33  ;;  %v1066_v47 = vadd.f32 %v3994_v49, %v1065_v63 }
 0x1c8   :  { %v1825_v54 = vadd.f32 1.0, %v2610_v52 }
 0x1c9   :  { %v1861_v60 = vsel %vm1860_vm2, %v2606_v1, %v1857_v0  ;;  %2613 = vpow2.f32 %v2358_v31  ;;  %1102 = vst [vmem:[#allocation2 + $0xb0] sm:$0xff] %v1066_v47 }
 0x1ca   :  { %v2612_v58 = vpop.eup %2611  ;;  %v1866_v24 = vsel %vm1863_vm3, %v1865_v7, %v1861_v60  ;;  %2615 = vrcp.f32 %v1825_v54  ;;  %v1892_v26 = vand.u32 2147483647, %v1825_v54  ;;  %v1894_v44 = vand.u32 2147483648, %v1825_v54 }
 0x1cb   :  { %v2079_v14 = vmul.f32 %v1866_v24, %v4123_v38  ;;  %v1869_v12 = vmul.f32 %v2612_v58, %v4155_v34  ;;  %vm1874_vm4 = vweird.f32 %v2612_v58  ;;  %vm1888_vm9 = vweird.f32 %v1825_v54 }
 0x1cc   :  { %v1741_v46 = vpop.f32.mrf.mxu1  ;;  %vm1875_vm6 = vmor %vm1873_vm5, %vm1874_vm4  ;;  %vm1893_vm11 = vcmp.eq.f32.partialorder %v1892_v26, 8.507059e+37  ;;  %v1895_v23 = vor.u32 1.1754944e-38, %v1894_v44 }
 0x1cd   :  { %v4181_v40 = vadd.f32 %v3936_v20, %v1741_v46  ;;  %2113 = vmatmul.f32.vlgmr.msrb.gmra.mxu3 %v2079_v14  ;;  %v1870_v9 = vsub.f32 1.0, %v1869_v12  ;;  %2110 = vmatmul.f32.vlgmr.msra.gmra.mxu2 %v2078_v56 }
 0x1cf   :  { %v2614_v8 = vpop.eup %2613  ;;  %v2359_v38 = vmul.f32 -1.442695, %v4181_v40  ;;  %v1871_v13 = vmul.f32 %v2612_v58, %v1870_v9 }
 0x1d0   :  { %v2616_v19 = vpop.eup %2615  ;;  %v1826_v4 = vadd.f32 1.0, %v2614_v8  ;;  %v1579_v36 = vpop.f32.mrf.mxu2 }
 0x1d1   :  { %2617 = vpow2.f32 %v2359_v38  ;;  %v1580_v32 = vadd.f32 %v3994_v49, %v1579_v36  ;;  %v1872_v18 = vadd.f32 %v2612_v58, %v1871_v13  ;;  %v1884_v25 = vmul.f32 %v2616_v19, %v1825_v54 }
 0x1d2   :  { %2619 = vrcp.f32 %v1826_v4  ;;  %v1068_v27 = vpop.f32.mrf.mxu3  ;;  %vm1889_vm8 = vweird.f32 %v2616_v19  ;;  %v1907_v10 = vand.u32 2147483647, %v1826_v4  ;;  %v1909_v59 = vand.u32 2147483648, %v1826_v4 }
 0x1d3   :  { %1628 = vst [vmem:[#allocation2 + $0x100] sm:$0xff] %v1580_v32  ;;  %v1876_v50 = vsel %vm1875_vm6, %v2612_v58, %v1872_v18  ;;  %v1885_v55 = vsub.f32 1.0, %v1884_v25  ;;  %v1069_v29 = vadd.f32 %v3994_v49, %v1068_v27  ;;  %vm1890_vm10 = vmor %vm1888_vm9, %vm1889_vm8  ;;  %vm1903_vm0 = vweird.f32 %v1826_v4 }
 0x1d4   :  { %v1744_v57 = vpop.f32.mrf.mxu1  ;;  %v1881_v62 = vsel %vm1878_vm7, %v1880_v3, %v1876_v50  ;;  %vm1908_vm14 = vcmp.eq.f32.partialorder %v1907_v10, 8.507059e+37 }
 0x1d5   :  { %v4189_v30 = vadd.f32 %v3936_v20, %v1744_v57  ;;  %v2080_v11 = vmul.f32 %v1881_v62, %v4140_v28  ;;  %v1886_v1 = vmul.f32 %v2616_v19, %v1885_v55  ;;  %1103 = vst [vmem:[#allocation2 + $0xb8] sm:$0xff] %v1069_v29 }
 0x1d7   :  { %v2618_v15 = vpop.eup %2617  ;;  %v2360_v6 = vmul.f32 -1.442695, %v4189_v30  ;;  %2116 = vmatmul.f32.gmra.mxu3 %v2080_v11  ;;  %v1887_v17 = vadd.f32 %v2616_v19, %v1886_v1 }
 0x1d8   :  { %v2620_v39 = vpop.eup %2619  ;;  %v1827_v43 = vadd.f32 1.0, %v2618_v15  ;;  %v1582_v34 = vpop.f32.mrf.mxu2 }
 0x1d9   :  { %2621 = vpow2.f32 %v2360_v6  ;;  %v1583_v28 = vadd.f32 %v3994_v49, %v1582_v34  ;;  %v1891_v45 = vsel %vm1890_vm10, %v2616_v19, %v1887_v17  ;;  %v1899_v21 = vmul.f32 %v2620_v39, %v1826_v4 }
 0x1da   :  { %2623 = vrcp.f32 %v1827_v43  ;;  %v1896_v48 = vsel %vm1893_vm11, %v1895_v23, %v1891_v45  ;;  %vm1904_vm12 = vweird.f32 %v2620_v39  ;;  %v1922_v56 = vand.u32 2147483647, %v1827_v43 }
 0x1db   :  { %1629 = vst [vmem:[#allocation2 + $0x108] sm:$0xff] %v1583_v28  ;;  %v2081_v16 = vmul.f32 %v1896_v48, %v4150_v41  ;;  %v1900_v5 = vsub.f32 1.0, %v1899_v21  ;;  %vm1905_vm13 = vmor %vm1903_vm0, %vm1904_vm12  ;;  %v1910_v41 = vor.u32 1.1754944e-38, %v1909_v59  ;;  %v1924_v46 = vand.u32 2147483648, %v1827_v43 }
 0x1dc   :  { %v1747_v51 = vpop.f32.mrf.mxu1  ;;  %v1071_v12 = vpop.f32.mrf.mxu3  ;;  %vm1918_vm1 = vweird.f32 %v1827_v43  ;;  %vm1923_vm3 = vcmp.eq.f32.partialorder %v1922_v56, 8.507059e+37 }
 0x1dd   :  { %v4197_v22 = vadd.f32 %v3936_v20, %v1747_v51  ;;  %v1901_v53 = vmul.f32 %v2620_v39, %v1900_v5  ;;  %v1072_v47 = vadd.f32 %v3994_v49, %v1071_v12  ;;  %v1925_v4 = vor.u32 1.1754944e-38, %v1924_v46 }
 0x1df   :  { %v2622_v35 = vpop.eup %2621  ;;  %v2361_v52 = vmul.f32 -1.442695, %v4197_v22  ;;  %2119 = vmatmul.f32.gmra.mxu3 %v2081_v16  ;;  %v1902_v61 = vadd.f32 %v2620_v39, %v1901_v53  ;;  %1104 = vst [vmem:[#allocation2 + $0xc0] sm:$0xff] %v1072_v47 }
 0x1e0   :  { %v2624_v0 = vpop.eup %2623  ;;  %v1828_v31 = vadd.f32 1.0, %v2622_v35  ;;  %v1585_v7 = vpop.f32.mrf.mxu2 }
 0x1e1   :  { %2625 = vpow2.f32 %v2361_v52  ;;  %v1586_v54 = vadd.f32 %v3994_v49, %v1585_v7  ;;  %v1906_v2 = vsel %vm1905_vm13, %v2620_v39, %v1902_v61  ;;  %v1914_v60 = vmul.f32 %v2624_v0, %v1827_v43 }
 0x1e2   :  { %2627 = vrcp.f32 %v1828_v31  ;;  %v1911_v58 = vsel %vm1908_vm14, %v1910_v41, %v1906_v2  ;;  %vm1919_vm15 = vweird.f32 %v2624_v0  ;;  %v1937_v57 = vand.u32 2147483647, %v1828_v31 }
 0x1e3   :  { %1630 = vst [vmem:[#allocation2 + $0x110] sm:$0xff] %v1586_v54  ;;  %v2082_v24 = vmul.f32 %v1911_v58, %v4169_v33  ;;  %v1915_v14 = vsub.f32 1.0, %v1914_v60  ;;  %vm1920_vm2 = vmor %vm1918_vm1, %vm1919_vm15  ;;  %v1939_v62 = vand.u32 2147483648, %v1828_v31  ;;  %vm1933_vm5 = vweird.f32 %v1828_v31 }
 0x1e4   :  { %v1750_v63 = vpop.f32.mrf.mxu1  ;;  %vm1938_vm7 = vcmp.eq.f32.partialorder %v1937_v57, 8.507059e+37 }
 0x1e5   :  { %v4204_v9 = vadd.f32 %v3936_v20, %v1750_v63  ;;  %v1916_v37 = vmul.f32 %v2624_v0, %v1915_v14  ;;  %v1940_v39 = vor.u32 1.1754944e-38, %v1939_v62 }
 0x1e7   :  { %v2626_v8 = vpop.eup %2625  ;;  %v2362_v38 = vmul.f32 -1.442695, %v4204_v9  ;;  %2122 = vmatmul.f32.gmra.mxu3 %v2082_v24  ;;  %v1917_v13 = vadd.f32 %v2624_v0, %v1916_v37 }
 0x1e8   :  { %v2628_v33 = vpop.eup %2627  ;;  %v4207_v42 = vadd.f32 1.0, %v2626_v8  ;;  %v1588_v19 = vpop.f32.mrf.mxu2 }
 0x1e9   :  { %2629 = vpow2.f32 %v2362_v38  ;;  %v1589_v36 = vadd.f32 %v3994_v49, %v1588_v19  ;;  %v1921_v32 = vsel %vm1920_vm2, %v2624_v0, %v1917_v13  ;;  %v1929_v18 = vmul.f32 %v2628_v33, %v1828_v31 }
 0x1ea   :  { %2631 = vrcp.f32 %v4207_v42  ;;  %v1926_v25 = vsel %vm1923_vm3, %v1925_v4, %v1921_v32  ;;  %v1074_v26 = vpop.f32.mrf.mxu3  ;;  %vm1934_vm4 = vweird.f32 %v2628_v33  ;;  %v1954_v16 = vand.u32 2147483648, %v4207_v42 }
 0x1eb   :  { %1631 = vst [vmem:[#allocation2 + $0x118] sm:$0xff] %v1589_v36  ;;  %v2083_v3 = vmul.f32 %v1926_v25, %v4181_v40  ;;  %v1930_v50 = vsub.f32 1.0, %v1929_v18  ;;  %v1075_v11 = vadd.f32 %v3994_v49, %v1074_v26  ;;  %vm1935_vm6 = vmor %vm1933_vm5, %vm1934_vm4  ;;  %v1952_v10 = vand.u32 2147483647, %v4207_v42 }
 0x1ec   :  { %v1753_v55 = vpop.f32.mrf.mxu1  ;;  %vm1948_vm9 = vweird.f32 %v4207_v42  ;;  %v1955_v0 = vor.u32 1.1754944e-38, %v1954_v16  ;;  %v2666_v16 = vld [vmem:[%s4328_s2] ss:$0 sm:$0xff] }
 0x1ed   :  { %v4213_v44 = vadd.f32 %v3936_v20, %v1753_v55  ;;  %v1931_v27 = vmul.f32 %v2628_v33, %v1930_v50  ;;  %1105 = vst [vmem:[#allocation2 + $0xc8] sm:$0xff] %v1075_v11  ;;  %vm1953_vm11 = vcmp.eq.f32.partialorder %v1952_v10, 8.507059e+37 }
 0x1ef   :  { %v2630_v1 = vpop.eup %2629  ;;  %v2363_v29 = vmul.f32 -1.442695, %v4213_v44  ;;  %2125 = vmatmul.f32.gmra.mxu3 %v2083_v3  ;;  %v1932_v15 = vadd.f32 %v2628_v33, %v1931_v27 }
 0x1f0   :  { %v2632_v40 = vpop.eup %2631  ;;  %v4217_v6 = vadd.f32 1.0, %v2630_v1  ;;  %v1591_v17 = vpop.f32.mrf.mxu2 }
 0x1f1   :  { %2633 = vpow2.f32 %v2363_v29  ;;  %v1592_v43 = vadd.f32 %v3994_v49, %v1591_v17  ;;  %v1936_v34 = vsel %vm1935_vm6, %v2628_v33, %v1932_v15  ;;  %v1944_v23 = vmul.f32 %v2632_v40, %v4207_v42 }
 0x1f2   :  { %2635 = vrcp.f32 %v4217_v6  ;;  %v1941_v28 = vsel %vm1938_vm7, %v1940_v39, %v1936_v34  ;;  %vm1949_vm8 = vweird.f32 %v2632_v40  ;;  %v1969_v63 = vand.u32 2147483648, %v4217_v6 }
 0x1f3   :  { %1632 = vst [vmem:[#allocation2 + $0x120] sm:$0xff] %v1592_v43  ;;  %v2084_v45 = vmul.f32 %v1941_v28, %v4189_v30  ;;  %v1945_v21 = vsub.f32 1.0, %v1944_v23  ;;  %vm1950_vm10 = vmor %vm1948_vm9, %vm1949_vm8  ;;  %v1967_v37 = vand.u32 2147483647, %v4217_v6  ;;  %vm1963_vm0 = vweird.f32 %v4217_v6 }
 0x1f4   :  { %v1756_v48 = vpop.f32.mrf.mxu1  ;;  %v1970_v42 = vor.u32 1.1754944e-38, %v1969_v63 }
 0x1f5   :  { %v4225_v5 = vadd.f32 %v3936_v20, %v1756_v48  ;;  %v1946_v51 = vmul.f32 %v2632_v40, %v1945_v21  ;;  %v1077_v31 = vpop.f32.mrf.mxu3  ;;  %vm1968_vm14 = vcmp.eq.f32.partialorder %v1967_v37, 8.507059e+37 }
 0x1f6   :  { %v1078_v54 = vadd.f32 %v3994_v49, %v1077_v31 }
 0x1f7   :  { %v2634_v59 = vpop.eup %2633  ;;  %v2364_v53 = vmul.f32 -1.442695, %v4225_v5  ;;  %2128 = vmatmul.f32.gmra.mxu3 %v2084_v45  ;;  %v1947_v35 = vadd.f32 %v2632_v40, %v1946_v51 }
 0x1f8   :  { %v2636_v52 = vpop.eup %2635  ;;  %v4230_v30 = vadd.f32 1.0, %v2634_v59  ;;  %v1594_v61 = vpop.f32.mrf.mxu2  ;;  %1106 = vst [vmem:[#allocation2 + $0xd0] sm:$0xff] %v1078_v54  ;;  %v4280_v54 = vld [vmem:[%s4330_s4] ss:$0 sm:$0xff] }
 0x1f9   :  { %2637 = vpow2.f32 %v2364_v53  ;;  %v1595_v7 = vadd.f32 %v3994_v49, %v1594_v61  ;;  %v1951_v41 = vsel %vm1950_vm10, %v2632_v40, %v1947_v35  ;;  %v1959_v60 = vmul.f32 %v2636_v52, %v4217_v6 }
 0x1fa   :  { %2639 = vrcp.f32 %v4230_v30  ;;  %v1956_v2 = vsel %vm1953_vm11, %v1955_v0, %v1951_v41  ;;  %vm1964_vm12 = vweird.f32 %v2636_v52  ;;  %v1982_v32 = vand.u32 2147483647, %v4230_v30 }
 0x1fb   :  { %1633 = vst [vmem:[#allocation2 + $0x128] sm:$0xff] %v1595_v7  ;;  %v2085_v24 = vmul.f32 %v1956_v2, %v4197_v22  ;;  %v1960_v12 = vsub.f32 1.0, %v1959_v60  ;;  %vm1965_vm13 = vmor %vm1963_vm0, %vm1964_vm12  ;;  %v1984_v18 = vand.u32 2147483648, %v4230_v30  ;;  %vm1978_vm1 = vweird.f32 %v4230_v30 }
 0x1fc   :  { %v1759_v58 = vpop.f32.mrf.mxu1  ;;  %vm1983_vm3 = vcmp.eq.f32.partialorder %v1982_v32, 8.507059e+37 }
 0x1fd   :  { %v4238_v14 = vadd.f32 %v3936_v20, %v1759_v58  ;;  %v1961_v47 = vmul.f32 %v2636_v52, %v1960_v12  ;;  %v1985_v15 = vor.u32 1.1754944e-38, %v1984_v18 }
 0x1ff   :  { %v2638_v56 = vpop.eup %2637  ;;  %v2365_v46 = vmul.f32 -1.442695, %v4238_v14  ;;  %2131 = vmatmul.f32.gmra.mxu3 %v2085_v24  ;;  %v1962_v33 = vadd.f32 %v2636_v52, %v1961_v47 }
 0x200   :  { %v2640_v8 = vpop.eup %2639  ;;  %v4243_v38 = vadd.f32 1.0, %v2638_v56  ;;  %v1597_v13 = vpop.f32.mrf.mxu2 }
 0x201   :  { %v1974_v22 = vmul.f32 %v2640_v8, %v4230_v30  ;;  %2641 = vpow2.f32 %v2365_v46  ;;  %v1598_v4 = vadd.f32 %v3994_v49, %v1597_v13  ;;  %v1966_v36 = vsel %vm1965_vm13, %v2636_v52, %v1962_v33  ;;  %v1080_v50 = vpop.f32.mrf.mxu3 }
 0x202   :  { %2643 = vrcp.f32 %v4243_v38  ;;  %vm1979_vm15 = vweird.f32 %v2640_v8  ;;  %v1971_v3 = vsel %vm1968_vm14, %v1970_v42, %v1966_v36  ;;  %v1081_v26 = vadd.f32 %v3994_v49, %v1080_v50 }
 0x203   :  { %v1975_v19 = vsub.f32 1.0, %v1974_v22  ;;  %1634 = vst [vmem:[#allocation2 + $0x130] sm:$0xff] %v1598_v4  ;;  %v2086_v62 = vmul.f32 %v1971_v3, %v4204_v9  ;;  %vm1980_vm2 = vmor %vm1978_vm1, %vm1979_vm15  ;;  %v1997_v23 = vand.u32 2147483647, %v4243_v38  ;;  %v1999_v28 = vand.u32 2147483648, %v4243_v38 }
 0x204   :  { %v1762_v25 = vpop.f32.mrf.mxu1  ;;  %1107 = vst [vmem:[#allocation2 + $0xd8] sm:$0xff] %v1081_v26  ;;  %vm1993_vm5 = vweird.f32 %v4243_v38 }
 0x205   :  { %v1976_v55 = vmul.f32 %v2640_v8, %v1975_v19  ;;  %v4252_v57 = vadd.f32 %v3936_v20, %v1762_v25  ;;  %v2000_v52 = vor.u32 1.1754944e-38, %v1999_v28  ;;  %vm1998_vm7 = vcmp.eq.f32.partialorder %v1997_v23, 8.507059e+37 }
 0x207   :  { %v2642_v27 = vpop.eup %2641  ;;  %v1977_v11 = vadd.f32 %v2640_v8, %v1976_v55  ;;  %v2366_v1 = vmul.f32 -1.442695, %v4252_v57  ;;  %2134 = vmatmul.f32.gmra.mxu3 %v2086_v62 }
 0x208   :  { %v2644_v29 = vpop.eup %2643  ;;  %v4259_v40 = vadd.f32 1.0, %v2642_v27  ;;  %v1600_v6 = vpop.f32.mrf.mxu2 }
 0x209   :  { %v1981_v20 = vsel %vm1980_vm2, %v2640_v8, %v1977_v11  ;;  %v1989_v9 = vmul.f32 %v2644_v29, %v4243_v38  ;;  %2645 = vpow2.f32 %v2366_v1  ;;  %v1601_v34 = vadd.f32 %v3994_v49, %v1600_v6 }
 0x20a   :  { %v1986_v17 = vsel %vm1983_vm3, %v1985_v15, %v1981_v20  ;;  %2647 = vrcp.f32 %v4259_v40  ;;  %vm1994_vm4 = vweird.f32 %v2644_v29  ;;  %v2012_v60 = vand.u32 2147483647, %v4259_v40 }
 0x20b   :  { %v2087_v39 = vmul.f32 %v1986_v17, %v4213_v44  ;;  %v1990_v43 = vsub.f32 1.0, %v1989_v9  ;;  %v1083_v21 = vpop.f32.mrf.mxu3  ;;  %1635 = vst [vmem:[#allocation2 + $0x138] sm:$0xff] %v1601_v34  ;;  %vm1995_vm6 = vmor %vm1993_vm5, %vm1994_vm4  ;;  %v2014_v58 = vand.u32 2147483648, %v4259_v40  ;;  %vm2008_vm9 = vweird.f32 %v4259_v40 }
 0x20c   :  { %v1765_v45 = vpop.f32.mrf.mxu1  ;;  %v1084_v44 = vadd.f32 %v3994_v49, %v1083_v21  ;;  %vm2013_vm11 = vcmp.eq.f32.partialorder %v2012_v60, 8.507059e+37 }
 0x20d   :  { %v1991_v48 = vmul.f32 %v2644_v29, %v1990_v43  ;;  %v4270_v51 = vadd.f32 %v2666_v16, %v1765_v45  ;;  %v2015_v38 = vor.u32 1.1754944e-38, %v2014_v58 }
 0x20e   :  { %1108 = vst [vmem:[#allocation2 + $0xe0] sm:$0xff] %v1084_v44 }
 0x20f   :  { %v2646_v10 = vpop.eup %2645  ;;  %v1992_v59 = vadd.f32 %v2644_v29, %v1991_v48  ;;  %v2367_v53 = vmul.f32 -1.442695, %v4270_v51  ;;  %2137 = vmatmul.f32.gmra.mxu3 %v2087_v39 }
 0x210   :  { %v2648_v35 = vpop.eup %2647  ;;  %v1834_v30 = vadd.f32 1.0, %v2646_v10  ;;  %v1603_v31 = vpop.f32.mrf.mxu2 }
 0x211   :  { %v1996_v61 = vsel %vm1995_vm6, %v2644_v29, %v1992_v59  ;;  %v2004_v0 = vmul.f32 %v2648_v35, %v4259_v40  ;;  %2649 = vpow2.f32 %v2367_v53  ;;  %v1604_v2 = vadd.f32 %v4280_v54, %v1603_v31 }
 0x212   :  { %v2001_v7 = vsel %vm1998_vm7, %v2000_v52, %v1996_v61  ;;  %2651 = vrcp.f32 %v1834_v30  ;;  %vm2009_vm8 = vweird.f32 %v2648_v35  ;;  %v2027_v18 = vand.u32 2147483647, %v1834_v30 }
 0x213   :  { %v2088_v49 = vmul.f32 %v2001_v7, %v4225_v5  ;;  %v2005_v41 = vsub.f32 1.0, %v2004_v0  ;;  %v1086_v12 = vpop.f32.mrf.mxu3  ;;  %1636 = vst [vmem:[#allocation2 + $0x140] sm:$0xff] %v1604_v2  ;;  %vm2010_vm10 = vmor %vm2008_vm9, %vm2009_vm8  ;;  %v2029_v25 = vand.u32 2147483648, %v1834_v30  ;;  %vm2023_vm0 = vweird.f32 %v1834_v30 }
 0x214   :  { %v1768_v24 = vpop.f32.mrf.mxu1  ;;  %v1087_v5 = vadd.f32 %v4280_v54, %v1086_v12  ;;  %vm2028_vm14 = vcmp.eq.f32.partialorder %v2027_v18, 8.507059e+37 }
 0x215   :  { %v2006_v63 = vmul.f32 %v2648_v35, %v2005_v41  ;;  %v4285_v56 = vadd.f32 %v2666_v16, %v1768_v24  ;;  %v2030_v29 = vor.u32 1.1754944e-38, %v2029_v25 }
 0x216   :  { %1109 = vst [vmem:[#allocation2 + $0xe8] sm:$0xff] %v1087_v5 }
 0x217   :  { %v2650_v46 = vpop.eup %2649  ;;  %v2007_v47 = vadd.f32 %v2648_v35, %v2006_v63  ;;  %v2368_v37 = vmul.f32 -1.442695, %v4285_v56  ;;  %2140 = vmatmul.f32.gmra.mxu3 %v2088_v49 }
 0x218   :  { %v2652_v8 = vpop.eup %2651  ;;  %v1835_v22 = vadd.f32 1.0, %v2650_v46  ;;  %v1606_v42 = vpop.f32.mrf.mxu2 }
 0x219   :  { %v2011_v13 = vsel %vm2010_vm10, %v2648_v35, %v2007_v47  ;;  %v2019_v33 = vmul.f32 %v2652_v8, %v1834_v30  ;;  %2653 = vpow2.f32 %v2368_v37  ;;  %v1607_v32 = vadd.f32 %v4280_v54, %v1606_v42 }
 0x21a   :  { %v2016_v19 = vsel %vm2013_vm11, %v2015_v38, %v2011_v13  ;;  %2655 = vrcp.f32 %v1835_v22  ;;  %vm2024_vm12 = vweird.f32 %v2652_v8  ;;  %v2044_v34 = vand.u32 2147483648, %v1835_v22 }
 0x21b   :  { %v2089_v4 = vmul.f32 %v2016_v19, %v4238_v14  ;;  %v2020_v36 = vsub.f32 1.0, %v2019_v33  ;;  %v1089_v50 = vpop.f32.mrf.mxu3  ;;  %1637 = vst [vmem:[#allocation2 + $0x148] sm:$0xff] %v1607_v32  ;;  %vm2025_vm13 = vmor %vm2023_vm0, %vm2024_vm12  ;;  %v2042_v45 = vand.u32 2147483647, %v1835_v22  ;;  %vm2038_vm1 = vweird.f32 %v1835_v22 }
 0x21c   :  { %v1771_v3 = vpop.f32.mrf.mxu1  ;;  %v1090_v26 = vadd.f32 %v4280_v54, %v1089_v50  ;;  %v2045_v10 = vor.u32 1.1754944e-38, %v2044_v34 }
 0x21d   :  { %v2021_v55 = vmul.f32 %v2652_v8, %v2020_v36  ;;  %v4292_v62 = vadd.f32 %v2666_v16, %v1771_v3  ;;  %vm2043_vm3 = vcmp.eq.f32.partialorder %v2042_v45, 8.507059e+37 }
 0x21e   :  { %1110 = vst [vmem:[#allocation2 + $0xf0] sm:$0xff] %v1090_v26 }
 0x21f   :  { %v2654_v27 = vpop.eup %2653  ;;  %v2022_v11 = vadd.f32 %v2652_v8, %v2021_v55  ;;  %v2369_v1 = vmul.f32 -1.442695, %v4292_v62  ;;  %2143 = vmatmul.f32.gmra.mxu3 %v2089_v4 }
 0x220   :  { %v2656_v14 = vpop.eup %2655  ;;  %v1836_v15 = vadd.f32 1.0, %v2654_v27  ;;  %v1609_v9 = vpop.f32.mrf.mxu2 }
 0x221   :  { %v2026_v40 = vsel %vm2025_vm13, %v2652_v8, %v2022_v11  ;;  %v2034_v20 = vmul.f32 %v2656_v14, %v1835_v22  ;;  %2657 = vpow2.f32 %v2369_v1  ;;  %v1610_v43 = vadd.f32 %v4280_v54, %v1609_v9 }
 0x222   :  { %v2031_v6 = vsel %vm2028_vm14, %v2030_v29, %v2026_v40  ;;  %2659 = vrcp.f32 %v1836_v15  ;;  %vm2039_vm15 = vweird.f32 %v2656_v14  ;;  %v2059_v31 = vand.u32 2147483648, %v1836_v15 }
 0x223   :  { %v2090_v17 = vmul.f32 %v2031_v6, %v4252_v57  ;;  %v2035_v39 = vsub.f32 1.0, %v2034_v20  ;;  %v1092_v23 = vpop.f32.mrf.mxu3  ;;  %1638 = vst [vmem:[#allocation2 + $0x150] sm:$0xff] %v1610_v43  ;;  %vm2040_vm2 = vmor %vm2038_vm1, %vm2039_vm15  ;;  %v2057_v49 = vand.u32 2147483647, %v1836_v15  ;;  %vm2053_vm5 = vweird.f32 %v1836_v15 }
 0x224   :  { %v1093_v21 = vadd.f32 %v4280_v54, %v1092_v23  ;;  %v2060_v60 = vor.u32 1.1754944e-38, %v2059_v31 }
 0x225   :  { %v2036_v28 = vmul.f32 %v2656_v14, %v2035_v39  ;;  %vm2058_vm7 = vcmp.eq.f32.partialorder %v2057_v49, 8.507059e+37 }
 0x226   :  { %1111 = vst [vmem:[#allocation2 + $0xf8] sm:$0xff] %v1093_v21 }
 0x227   :  { %v2658_v48 = vpop.eup %2657  ;;  %v2037_v16 = vadd.f32 %v2656_v14, %v2036_v28  ;;  %2146 = vmatmul.f32.gmra.mxu3 %v2090_v17 }
 0x228   :  { %v2660_v44 = vpop.eup %2659  ;;  %v1837_v57 = vadd.f32 1.0, %v2658_v48  ;;  %v1612_v35 = vpop.f32.mrf.mxu2 }
 0x229   :  { %v2041_v59 = vsel %vm2040_vm2, %v2656_v14, %v2037_v16  ;;  %v2049_v53 = vmul.f32 %v2660_v44, %v1836_v15  ;;  %v1613_v0 = vadd.f32 %v4280_v54, %v1612_v35  ;;  %vm2054_vm4 = vweird.f32 %v2660_v44 }
 0x22a   :  { %v2046_v52 = vsel %vm2043_vm3, %v2045_v10, %v2041_v59  ;;  %2661 = vrcp.f32 %v1837_v57  ;;  %vm2055_vm6 = vmor %vm2053_vm5, %vm2054_vm4  ;;  %v2074_v47 = vand.u32 2147483648, %v1837_v57  ;;  %v2072_v8 = vand.u32 2147483647, %v1837_v57 }
 0x22b   :  { %v2091_v30 = vmul.f32 %v2046_v52, %v4270_v51  ;;  %v2050_v61 = vsub.f32 1.0, %v2049_v53  ;;  %1639 = vst [vmem:[#allocation2 + $0x158] sm:$0xff] %v1613_v0  ;;  %vm2068_vm9 = vweird.f32 %v1837_v57 }
 0x22c   :  { %v2075_v22 = vor.u32 1.1754944e-38, %v2074_v47  ;;  %vm2073_vm11 = vcmp.eq.f32.partialorder %v2072_v8, 8.507059e+37 }
 0x22d   :  { %v2051_v7 = vmul.f32 %v2660_v44, %v2050_v61 }
 0x22f   :  { %v2052_v41 = vadd.f32 %v2660_v44, %v2051_v7  ;;  %2149 = vmatmul.f32.gmra.mxu3 %v2091_v30 }
 0x230   :  { %v2662_v2 = vpop.eup %2661  ;;  %v1615_v12 = vpop.f32.mrf.mxu2 }
 0x231   :  { %v2056_v58 = vsel %vm2055_vm6, %v2660_v44, %v2052_v41  ;;  %v2064_v24 = vmul.f32 %v2662_v2, %v1837_v57  ;;  %v1616_v51 = vadd.f32 %v4280_v54, %v1615_v12  ;;  %vm2069_vm8 = vweird.f32 %v2662_v2 }
 0x232   :  { %v2061_v63 = vsel %vm2058_vm7, %v2060_v60, %v2056_v58  ;;  %vm2070_vm10 = vmor %vm2068_vm9, %vm2069_vm8 }
 0x233   :  { %v2092_v5 = vmul.f32 %v2061_v63, %v4285_v56  ;;  %v2065_v46 = vsub.f32 1.0, %v2064_v24  ;;  %1640 = vst [vmem:[#allocation2 + $0x160] sm:$0xff] %v1616_v51 }
 0x235   :  { %v2066_v37 = vmul.f32 %v2662_v2, %v2065_v46 }
 0x237   :  { %v2067_v38 = vadd.f32 %v2662_v2, %v2066_v37  ;;  %2152 = vmatmul.f32.gmra.mxu3 %v2092_v5 }
 0x238   :  { %v1618_v33 = vpop.f32.mrf.mxu2 }
 0x239   :  { %v2071_v13 = vsel %vm2070_vm10, %v2662_v2, %v2067_v38  ;;  %v1619_v19 = vadd.f32 %v4280_v54, %v1618_v33 }
 0x23a   :  { %v2076_v42 = vsel %vm2073_vm11, %v2075_v22, %v2071_v13 }
 0x23b   :  { %v2093_v4 = vmul.f32 %v2076_v42, %v4292_v62  ;;  %1641 = vst [vmem:[#allocation2 + $0x168] sm:$0xff] %v1619_v19 }
 0x23f   :  { %2155 = vmatmul.f32.gmra.mxu3 %v2093_v4 }
 0x240   :  { %v1621_v56 = vpop.f32.mrf.mxu2 }
 0x241   :  { %v1622_v36 = vadd.f32 %v4280_v54, %v1621_v56 }
 0x243   :  { %1642 = vst [vmem:[#allocation2 + $0x170] sm:$0xff] %v1622_v36 }
 0x248   :  { %v1624_v32 = vpop.f32.mrf.mxu2 }
 0x249   :  { %v1625_v18 = vadd.f32 %v4280_v54, %v1624_v32 }
 0x24b   :  { %1643 = vst [vmem:[#allocation2 + $0x178] sm:$0xff] %v1625_v18 }
 0x250   :  { %v2114_v25 = vpop.f32.mrf.mxu3  ;;  %v2111_v3 = vpop.f32.mrf.mxu2 }
 0x251   :  { %v2115_v50 = vadd.f32 %v4280_v54, %v2114_v25  ;;  %v2112_v55 = vadd.f32 %v4280_v54, %v2111_v3 }
 0x253   :  { %2161 = vst [vmem:[#allocation2 + $0x188] sm:$0xff] %v2115_v50 }
 0x254   :  { %2160 = vst [vmem:[#allocation2 + $0x180] sm:$0xff] %v2112_v55 }
 0x25a   :  { %v2117_v26 = vpop.f32.mrf.mxu3 }
 0x25b   :  { %v2118_v62 = vadd.f32 %v4280_v54, %v2117_v26 }
 0x25d   :  { %2162 = vst [vmem:[#allocation2 + $0x190] sm:$0xff] %v2118_v62 }
 0x262   :  { %v2120_v27 = vpop.f32.mrf.mxu3 }
 0x263   :  { %v2121_v11 = vadd.f32 %v4280_v54, %v2120_v27 }
 0x265   :  { %2163 = vst [vmem:[#allocation2 + $0x198] sm:$0xff] %v2121_v11 }
 0x26a   :  { %v2123_v1 = vpop.f32.mrf.mxu3 }
 0x26b   :  { %v2124_v14 = vadd.f32 %v4280_v54, %v2123_v1 }
 0x26d   :  { %2164 = vst [vmem:[#allocation2 + $0x1a0] sm:$0xff] %v2124_v14 }
 0x272   :  { %v2126_v29 = vpop.f32.mrf.mxu3 }
 0x273   :  { %v2127_v15 = vadd.f32 %v4280_v54, %v2126_v29 }
 0x275   :  { %2165 = vst [vmem:[#allocation2 + $0x1a8] sm:$0xff] %v2127_v15 }
 0x27a   :  { %v2129_v40 = vpop.f32.mrf.mxu3 }
 0x27b   :  { %v2130_v20 = vadd.f32 %v4280_v54, %v2129_v40 }
 0x27d   :  { %2166 = vst [vmem:[#allocation2 + $0x1b0] sm:$0xff] %v2130_v20 }
 0x282   :  { %v2132_v9 = vpop.f32.mrf.mxu3 }
 0x283   :  { %v2133_v6 = vadd.f32 %v4280_v54, %v2132_v9 }
 0x285   :  { %2167 = vst [vmem:[#allocation2 + $0x1b8] sm:$0xff] %v2133_v6 }
 0x28a   :  { %v2135_v17 = vpop.f32.mrf.mxu3 }
 0x28b   :  { %v2136_v39 = vadd.f32 %v4280_v54, %v2135_v17 }
 0x28d   :  { %2168 = vst [vmem:[#allocation2 + $0x1c0] sm:$0xff] %v2136_v39 }
 0x292   :  { %v2138_v43 = vpop.f32.mrf.mxu3 }
 0x293   :  { %v2139_v34 = vadd.f32 %v4280_v54, %v2138_v43 }
 0x295   :  { %2169 = vst [vmem:[#allocation2 + $0x1c8] sm:$0xff] %v2139_v34 }
 0x29a   :  { %v2141_v23 = vpop.f32.mrf.mxu3 }
 0x29b   :  { %v2142_v28 = vadd.f32 %v4280_v54, %v2141_v23 }
 0x29d   :  { %2170 = vst [vmem:[#allocation2 + $0x1d0] sm:$0xff] %v2142_v28 }
 0x2a2   :  { %v2144_v45 = vpop.f32.mrf.mxu3 }
 0x2a3   :  { %v2145_v21 = vadd.f32 %v4280_v54, %v2144_v45 }
 0x2a5   :  { %2171 = vst [vmem:[#allocation2 + $0x1d8] sm:$0xff] %v2145_v21 }
 0x2aa   :  { %v2147_v48 = vpop.f32.mrf.mxu3 }
 0x2ab   :  { %v2148_v16 = vadd.f32 %v4280_v54, %v2147_v48 }
 0x2ad   :  { %2172 = vst [vmem:[#allocation2 + $0x1e0] sm:$0xff] %v2148_v16 }
 0x2b2   :  { %v2150_v44 = vpop.f32.mrf.mxu3 }
 0x2b3   :  { %v2151_v10 = vadd.f32 %v4280_v54, %v2150_v44 }
 0x2b5   :  { %2173 = vst [vmem:[#allocation2 + $0x1e8] sm:$0xff] %v2151_v10 }
 0x2ba   :  { %v2153_v57 = vpop.f32.mrf.mxu3 }
 0x2bb   :  { %v2154_v59 = vadd.f32 %v4280_v54, %v2153_v57 }
 0x2bd   :  { %2174 = vst [vmem:[#allocation2 + $0x1f0] sm:$0xff] %v2154_v59 }
 0x2c2   :  { %v2156_v53 = vpop.f32.mrf.mxu3 }
 0x2c3   :  { %v2157_v35 = vadd.f32 %v4280_v54, %v2156_v53 }
 0x2c5   :  { %2175 = vst [vmem:[#allocation2 + $0x1f8] sm:$0xff] %v2157_v35 }
 0x2c6   :  { %2179 = vsyncadd [#allocation3], 128  ;;  %s2182_s13 = sshll.u32 %s4331_s5, 4  ;;  %s2694_s14 = smov [#allocation2]   ;;  %s2183_s13 = int_to_ptr.hbm [resolvable:$true] %s2182_s13 }
 0x2c7   :  { %s2180_s15 = sshll.u32 %s2694_s14, 4  ;;  %s2695_s16 = smov 128   ;;  %s2181_s15 = int_to_ptr.vmem [resolvable:$true] %s2180_s15 }
 0x2c8   :  { %s2696_s17 = smov 8  }
 0x2c9   :  { %2188 = dma.vmem_to_hbm [thread:$0]  %s2181_s15, 8064, %s2183_s13, [#allocation3], %s2695_s16, %s2695_s16, %s2696_s17  }
 0x2ca   :  { %2692 = dma.done.wait [#allocation3], 8192  }
 0x2cb   :  { %2693 = vsyncadd [#allocation3], 4294959104 }
 0x2cc   :  { %2193 = vsyncpa [#allocation3], 1 }

</bundles_post_ra>
